<compile_context>
chip_gen: v6e
topology: v6e:2x2x1
jax: 0.10.0
libtpu: 0.0.40
codegen_flags: <defaults>
</compile_context>

<pallas_src>
import jax
import jax.numpy as jnp
import numpy as np
from jax.experimental import pallas as pl
from jax.experimental.pallas import tpu as pltpu

LN_EPS = 1e-5


# ----------------------------- Pallas kernel -------------------------------
def _critic_kernel(*refs):
    (rgb_ref, low_ref, act_ref,
     wr, br, gr, betar,                      # rgb encoder: Linear + LayerNorm
     wl, bl, gl, betal,                      # low-dim encoder
     q1w1r, q1w1l, q1w1a, q1b1, q1w2, q1b2, q1w3, q1b3,   # Q1 head
     q2w1r, q2w1l, q2w1a, q2b1, q2w2, q2b2, q2w3, q2b3,   # Q2 head
     q1_out_ref, q2_out_ref) = refs

    f32 = jnp.float32

    def encode(x, w, b, g, beta):
        # Linear -> LayerNorm -> Tanh, all in vregs.
        h = jnp.dot(x, w[...], preferred_element_type=f32) + b[...]
        mu = jnp.mean(h, axis=-1, keepdims=True)
        d = h - mu
        var = jnp.mean(d * d, axis=-1, keepdims=True)
        hn = d * jax.lax.rsqrt(var + LN_EPS)
        return jnp.tanh(hn * g[...] + beta[...])

    rgb_h = encode(rgb_ref[...], wr, br, gr, betar)
    low_h = encode(low_ref[...], wl, bl, gl, betal)
    act = act_ref[...]

    def q_head(w1r, w1l, w1a, b1, w2, b2, w3, b3):
        # concat([rgb_h, low_h, act]) @ W1  ==  sum of three split matmuls.
        h1 = (jnp.dot(rgb_h, w1r[...], preferred_element_type=f32)
              + jnp.dot(low_h, w1l[...], preferred_element_type=f32)
              + jnp.dot(act,   w1a[...], preferred_element_type=f32)
              + b1[...])
        h1 = jnp.maximum(h1, 0.0)
        h2 = jnp.dot(h1, w2[...], preferred_element_type=f32) + b2[...]
        h2 = jnp.maximum(h2, 0.0)
        return jnp.dot(h2, w3[...], preferred_element_type=f32) + b3[...]

    q1_out_ref[...] = q_head(q1w1r, q1w1l, q1w1a, q1b1, q1w2, q1b2, q1w3, q1b3)
    q2_out_ref[...] = q_head(q2w1r, q2w1l, q2w1a, q2b1, q2w2, q2b2, q2w3, q2b3)


# ------------------------------ wrapper -------------------------------------
def critic_forward(params, rgb_obs, low_dim_obs, actions, out_shape):
    B = rgb_obs.shape[0]
    out_dim = 1
    for s in out_shape:
        out_dim *= s

    TB = B if B <= 256 else 256            # batch tile (rows per grid step)
    assert B % TB == 0, "demo batch must be divisible by the batch tile"

    F = params["wr"].shape[1]              # feature_dim

    def split_q(p):
        w1 = p["w1"]                       # (2F + A, H), rows pre-split
        return [w1[:F], w1[F:2 * F], w1[2 * F:], p["b1"],
                p["w2"], p["b2"], p["w3"], p["b3"]]

    param_arrays = (
        [params["wr"], params["br"], params["gr"], params["betar"],
         params["wl"], params["bl"], params["gl"], params["betal"]]
        + split_q(params["q1"]) + split_q(params["q2"])
    )

    data_arrays = [rgb_obs, low_dim_obs, actions]
    data_specs = [
        pl.BlockSpec((TB, rgb_obs.shape[1]), lambda i: (i, 0)),
        pl.BlockSpec((TB, low_dim_obs.shape[1]), lambda i: (i, 0)),
        pl.BlockSpec((TB, actions.shape[1]), lambda i: (i, 0)),
    ]
    # Weights/biases: whole-array VMEM blocks, same block for every grid step.
    param_specs = [pl.BlockSpec(p.shape, lambda i: (0, 0)) for p in param_arrays]

    out_spec = pl.BlockSpec((TB, out_dim), lambda i: (i, 0))

    q1, q2 = pl.pallas_call(
        _critic_kernel,
        out_shape=(jax.ShapeDtypeStruct((B, out_dim), jnp.float32),
                   jax.ShapeDtypeStruct((B, out_dim), jnp.float32)),
        grid=(B // TB,),
        in_specs=data_specs + param_specs,
        out_specs=(out_spec, out_spec),
        compiler_params=pltpu.CompilerParams(
            dimension_semantics=("parallel",)),   # megacore sharding on v7x
    )(*data_arrays, *param_arrays)

    # PyTorch semantics: view each head to out_shape, then cat along -1.
    q1 = q1.reshape(B, *out_shape)
    q2 = q2.reshape(B, *out_shape)
    return jnp.concatenate([q1, q2], axis=-1)


# --------------------------- synthetic params --------------------------------
def init_params(key, repr_dim, low_dim, action_dim, feature_dim, hidden_dim,
                out_dim):
    keys = iter(jax.random.split(key, 20))

    def linear_w(din, dout):
        return (jax.random.normal(next(keys), (din, dout), jnp.float32)
                / np.sqrt(din))

    def bias(dout, scale=0.01):
        return scale * jax.random.normal(next(keys), (1, dout), jnp.float32)

    def layernorm(dim):
        g = 1.0 + 0.05 * jax.random.normal(next(keys), (1, dim), jnp.float32)
        b = 0.05 * jax.random.normal(next(keys), (1, dim), jnp.float32)
        return g, b

    params = {}
    params["wr"] = linear_w(repr_dim, feature_dim)
    params["br"] = bias(feature_dim)
    params["gr"], params["betar"] = layernorm(feature_dim)
    params["wl"] = linear_w(low_dim, feature_dim)
    params["bl"] = bias(feature_dim)
    params["gl"], params["betal"] = layernorm(feature_dim)

    in_dim = 2 * feature_dim + action_dim

    def q_params():
        return {
            "w1": linear_w(in_dim, hidden_dim), "b1": bias(hidden_dim),
            "w2": linear_w(hidden_dim, hidden_dim), "b2": bias(hidden_dim),
            "w3": linear_w(hidden_dim, out_dim), "b3": bias(out_dim),
        }

    params["q1"] = q_params()
    params["q2"] = q_params()
    return params


# --------------------------- pure-JAX reference ------------------------------
def reference(params, rgb, low, act, out_shape):
    P = jax.lax.Precision.HIGHEST

    def enc(x, w, b, g, beta):
        h = jnp.dot(x, w, precision=P) + b
        mu = jnp.mean(h, -1, keepdims=True)
        var = jnp.mean((h - mu) ** 2, -1, keepdims=True)
        hn = (h - mu) / jnp.sqrt(var + LN_EPS)
        return jnp.tanh(hn * g + beta)

    rgb_h = enc(rgb, params["wr"], params["br"], params["gr"], params["betar"])
    low_h = enc(low, params["wl"], params["bl"], params["gl"], params["betal"])
    h = jnp.concatenate([rgb_h, low_h, act], axis=-1)

    def q(p):
        h1 = jnp.maximum(jnp.dot(h, p["w1"], precision=P) + p["b1"], 0.0)
        h2 = jnp.maximum(jnp.dot(h1, p["w2"], precision=P) + p["b2"], 0.0)
        return jnp.dot(h2, p["w3"], precision=P) + p["b3"]

    B = rgb.shape[0]
    q1 = q(params["q1"]).reshape(B, *out_shape)
    q2 = q(params["q2"]).reshape(B, *out_shape)
    return jnp.concatenate([q1, q2], axis=-1)


if __name__ == "__main__":
    B = 8
    repr_dim, low_dim, action_dim = 128, 16, 8
    feature_dim, hidden_dim = 64, 128
    out_shape = (1,)
    out_dim = 1
    for s in out_shape:
        out_dim *= s

    key = jax.random.PRNGKey(0)
    kp, k1, k2, k3 = jax.random.split(key, 4)
    params = init_params(kp, repr_dim, low_dim, action_dim, feature_dim,
                         hidden_dim, out_dim)
    rgb = jax.random.normal(k1, (B, repr_dim), jnp.float32)
    low = jax.random.normal(k2, (B, low_dim), jnp.float32)
    act = jax.random.uniform(k3, (B, action_dim), jnp.float32, -1.0, 1.0)

    qs = critic_forward(params, rgb, low, act, out_shape)
    qs = jax.block_until_ready(qs)
    assert qs.shape == (B,) + out_shape[:-1] + (2 * out_shape[-1],), qs.shape

    ref = reference(params, rgb, low, act, out_shape)
    np.testing.assert_allclose(np.asarray(qs), np.asarray(ref),
                               rtol=2e-2, atol=2e-2)
    print("KERNEL_OK")
</pallas_src>

<mosaic_0001>
module attributes {stable_mosaic.version = 11 : i64} {
  func.func @_critic_kernel(%arg0: i32, %arg1: memref<8x128xf32, #tpu.memory_space<vmem>>, %arg2: memref<8x16xf32, #tpu.memory_space<vmem>>, %arg3: memref<8x8xf32, #tpu.memory_space<vmem>>, %arg4: memref<128x64xf32, #tpu.memory_space<vmem>>, %arg5: memref<1x64xf32, #tpu.memory_space<vmem>>, %arg6: memref<1x64xf32, #tpu.memory_space<vmem>>, %arg7: memref<1x64xf32, #tpu.memory_space<vmem>>, %arg8: memref<16x64xf32, #tpu.memory_space<vmem>>, %arg9: memref<1x64xf32, #tpu.memory_space<vmem>>, %arg10: memref<1x64xf32, #tpu.memory_space<vmem>>, %arg11: memref<1x64xf32, #tpu.memory_space<vmem>>, %arg12: memref<64x128xf32, #tpu.memory_space<vmem>>, %arg13: memref<64x128xf32, #tpu.memory_space<vmem>>, %arg14: memref<8x128xf32, #tpu.memory_space<vmem>>, %arg15: memref<1x128xf32, #tpu.memory_space<vmem>>, %arg16: memref<128x128xf32, #tpu.memory_space<vmem>>, %arg17: memref<1x128xf32, #tpu.memory_space<vmem>>, %arg18: memref<128x1xf32, #tpu.memory_space<vmem>>, %arg19: memref<1x1xf32, #tpu.memory_space<vmem>>, %arg20: memref<64x128xf32, #tpu.memory_space<vmem>>, %arg21: memref<64x128xf32, #tpu.memory_space<vmem>>, %arg22: memref<8x128xf32, #tpu.memory_space<vmem>>, %arg23: memref<1x128xf32, #tpu.memory_space<vmem>>, %arg24: memref<128x128xf32, #tpu.memory_space<vmem>>, %arg25: memref<1x128xf32, #tpu.memory_space<vmem>>, %arg26: memref<128x1xf32, #tpu.memory_space<vmem>>, %arg27: memref<1x1xf32, #tpu.memory_space<vmem>>, %arg28: memref<8x1xf32, #tpu.memory_space<vmem>>, %arg29: memref<8x1xf32, #tpu.memory_space<vmem>>) attributes {dimension_semantics = [#tpu.dimension_semantics<parallel>], iteration_bounds = array<i64: 1>, scalar_prefetch = 0 : i64, scratch_operands = 0 : i64, tpu.core_type = #tpu.core_type<tc>, window_params = [{transform_indices = @transform_0, window_bounds = array<i64: 8, 128>}, {transform_indices = @transform_1, window_bounds = array<i64: 8, 16>}, {transform_indices = @transform_2, window_bounds = array<i64: 8, 8>}, {pipeline_mode = #tpu.pipeline_mode<synchronous>, transform_indices = @transform_3, window_bounds = array<i64: 128, 64>}, {pipeline_mode = #tpu.pipeline_mode<synchronous>, transform_indices = @transform_4, window_bounds = array<i64: 1, 64>}, {pipeline_mode = #tpu.pipeline_mode<synchronous>, transform_indices = @transform_5, window_bounds = array<i64: 1, 64>}, {pipeline_mode = #tpu.pipeline_mode<synchronous>, transform_indices = @transform_6, window_bounds = array<i64: 1, 64>}, {pipeline_mode = #tpu.pipeline_mode<synchronous>, transform_indices = @transform_7, window_bounds = array<i64: 16, 64>}, {pipeline_mode = #tpu.pipeline_mode<synchronous>, transform_indices = @transform_8, window_bounds = array<i64: 1, 64>}, {pipeline_mode = #tpu.pipeline_mode<synchronous>, transform_indices = @transform_9, window_bounds = array<i64: 1, 64>}, {pipeline_mode = #tpu.pipeline_mode<synchronous>, transform_indices = @transform_10, window_bounds = array<i64: 1, 64>}, {pipeline_mode = #tpu.pipeline_mode<synchronous>, transform_indices = @transform_11, window_bounds = array<i64: 64, 128>}, {pipeline_mode = #tpu.pipeline_mode<synchronous>, transform_indices = @transform_12, window_bounds = array<i64: 64, 128>}, {pipeline_mode = #tpu.pipeline_mode<synchronous>, transform_indices = @transform_13, window_bounds = array<i64: 8, 128>}, {pipeline_mode = #tpu.pipeline_mode<synchronous>, transform_indices = @transform_14, window_bounds = array<i64: 1, 128>}, {pipeline_mode = #tpu.pipeline_mode<synchronous>, transform_indices = @transform_15, window_bounds = array<i64: 128, 128>}, {pipeline_mode = #tpu.pipeline_mode<synchronous>, transform_indices = @transform_16, window_bounds = array<i64: 1, 128>}, {pipeline_mode = #tpu.pipeline_mode<synchronous>, transform_indices = @transform_17, window_bounds = array<i64: 128, 1>}, {pipeline_mode = #tpu.pipeline_mode<synchronous>, transform_indices = @transform_18, window_bounds = array<i64: 1, 1>}, {pipeline_mode = #tpu.pipeline_mode<synchronous>, transform_indices = @transform_19, window_bounds = array<i64: 64, 128>}, {pipeline_mode = #tpu.pipeline_mode<synchronous>, transform_indices = @transform_20, window_bounds = array<i64: 64, 128>}, {pipeline_mode = #tpu.pipeline_mode<synchronous>, transform_indices = @transform_21, window_bounds = array<i64: 8, 128>}, {pipeline_mode = #tpu.pipeline_mode<synchronous>, transform_indices = @transform_22, window_bounds = array<i64: 1, 128>}, {pipeline_mode = #tpu.pipeline_mode<synchronous>, transform_indices = @transform_23, window_bounds = array<i64: 128, 128>}, {pipeline_mode = #tpu.pipeline_mode<synchronous>, transform_indices = @transform_24, window_bounds = array<i64: 1, 128>}, {pipeline_mode = #tpu.pipeline_mode<synchronous>, transform_indices = @transform_25, window_bounds = array<i64: 128, 1>}, {pipeline_mode = #tpu.pipeline_mode<synchronous>, transform_indices = @transform_26, window_bounds = array<i64: 1, 1>}, {transform_indices = @transform_27, window_bounds = array<i64: 8, 1>}, {transform_indices = @transform_28, window_bounds = array<i64: 8, 1>}]} {
    %c0 = arith.constant 0 : index
    %c0_0 = arith.constant 0 : index
    %0 = vector.load %arg1[%c0, %c0_0] : memref<8x128xf32, #tpu.memory_space<vmem>>, vector<8x128xf32>
    %c0_1 = arith.constant 0 : index
    %c0_2 = arith.constant 0 : index
    %1 = vector.load %arg4[%c0_1, %c0_2] : memref<128x64xf32, #tpu.memory_space<vmem>>, vector<128x64xf32>
    %cst = arith.constant dense<0.000000e+00> : vector<8x64xf32>
    %2 = tpu.matmul %0, %1, %cst {dimension_numbers = #tpu.dot_dimension_numbers<[1], [0], [0], [1], [0, 0, 1, 1], [], []>} : vector<8x128xf32>, vector<128x64xf32>, vector<8x64xf32> -> vector<8x64xf32>
    %c0_3 = arith.constant 0 : index
    %c0_4 = arith.constant 0 : index
    %3 = vector.load %arg5[%c0_3, %c0_4] : memref<1x64xf32, #tpu.memory_space<vmem>>, vector<1x64xf32>
    %4 = vector.broadcast %3 : vector<1x64xf32> to vector<8x64xf32>
    %5 = arith.addf %2, %4 : vector<8x64xf32>
    %cst_5 = arith.constant dense<0.000000e+00> : vector<8xf32>
    %6 = vector.multi_reduction <add>, %5, %cst_5 [1] : vector<8x64xf32> to vector<8xf32>
    %7 = vector.shape_cast %6 : vector<8xf32> to vector<8x1xf32>
    %cst_6 = arith.constant 6.400000e+01 : f32
    %8 = vector.broadcast %cst_6 : f32 to vector<8x1xf32>
    %9 = arith.divf %7, %8 : vector<8x1xf32>
    %10 = vector.broadcast %9 : vector<8x1xf32> to vector<8x64xf32>
    %11 = arith.subf %5, %10 : vector<8x64xf32>
    %12 = arith.mulf %11, %11 : vector<8x64xf32>
    %cst_7 = arith.constant dense<0.000000e+00> : vector<8xf32>
    %13 = vector.multi_reduction <add>, %12, %cst_7 [1] : vector<8x64xf32> to vector<8xf32>
    %14 = vector.shape_cast %13 : vector<8xf32> to vector<8x1xf32>
    %cst_8 = arith.constant 6.400000e+01 : f32
    %15 = vector.broadcast %cst_8 : f32 to vector<8x1xf32>
    %16 = arith.divf %14, %15 : vector<8x1xf32>
    %cst_9 = arith.constant 9.99999974E-6 : f32
    %17 = vector.broadcast %cst_9 : f32 to vector<8x1xf32>
    %18 = arith.addf %16, %17 : vector<8x1xf32>
    %19 = math.rsqrt %18 : vector<8x1xf32>
    %20 = vector.broadcast %19 : vector<8x1xf32> to vector<8x64xf32>
    %21 = arith.mulf %11, %20 : vector<8x64xf32>
    %c0_10 = arith.constant 0 : index
    %c0_11 = arith.constant 0 : index
    %22 = vector.load %arg6[%c0_10, %c0_11] : memref<1x64xf32, #tpu.memory_space<vmem>>, vector<1x64xf32>
    %23 = vector.broadcast %22 : vector<1x64xf32> to vector<8x64xf32>
    %24 = arith.mulf %21, %23 : vector<8x64xf32>
    %c0_12 = arith.constant 0 : index
    %c0_13 = arith.constant 0 : index
    %25 = vector.load %arg7[%c0_12, %c0_13] : memref<1x64xf32, #tpu.memory_space<vmem>>, vector<1x64xf32>
    %26 = vector.broadcast %25 : vector<1x64xf32> to vector<8x64xf32>
    %27 = arith.addf %24, %26 : vector<8x64xf32>
    %28 = math.tanh %27 : vector<8x64xf32>
    %c0_14 = arith.constant 0 : index
    %c0_15 = arith.constant 0 : index
    %29 = vector.load %arg2[%c0_14, %c0_15] : memref<8x16xf32, #tpu.memory_space<vmem>>, vector<8x16xf32>
    %c0_16 = arith.constant 0 : index
    %c0_17 = arith.constant 0 : index
    %30 = vector.load %arg8[%c0_16, %c0_17] : memref<16x64xf32, #tpu.memory_space<vmem>>, vector<16x64xf32>
    %cst_18 = arith.constant dense<0.000000e+00> : vector<8x64xf32>
    %31 = tpu.matmul %29, %30, %cst_18 {dimension_numbers = #tpu.dot_dimension_numbers<[1], [0], [0], [1], [0, 0, 1, 1], [], []>} : vector<8x16xf32>, vector<16x64xf32>, vector<8x64xf32> -> vector<8x64xf32>
    %c0_19 = arith.constant 0 : index
    %c0_20 = arith.constant 0 : index
    %32 = vector.load %arg9[%c0_19, %c0_20] : memref<1x64xf32, #tpu.memory_space<vmem>>, vector<1x64xf32>
    %33 = vector.broadcast %32 : vector<1x64xf32> to vector<8x64xf32>
    %34 = arith.addf %31, %33 : vector<8x64xf32>
    %cst_21 = arith.constant dense<0.000000e+00> : vector<8xf32>
    %35 = vector.multi_reduction <add>, %34, %cst_21 [1] : vector<8x64xf32> to vector<8xf32>
    %36 = vector.shape_cast %35 : vector<8xf32> to vector<8x1xf32>
    %cst_22 = arith.constant 6.400000e+01 : f32
    %37 = vector.broadcast %cst_22 : f32 to vector<8x1xf32>
    %38 = arith.divf %36, %37 : vector<8x1xf32>
    %39 = vector.broadcast %38 : vector<8x1xf32> to vector<8x64xf32>
    %40 = arith.subf %34, %39 : vector<8x64xf32>
    %41 = arith.mulf %40, %40 : vector<8x64xf32>
    %cst_23 = arith.constant dense<0.000000e+00> : vector<8xf32>
    %42 = vector.multi_reduction <add>, %41, %cst_23 [1] : vector<8x64xf32> to vector<8xf32>
    %43 = vector.shape_cast %42 : vector<8xf32> to vector<8x1xf32>
    %cst_24 = arith.constant 6.400000e+01 : f32
    %44 = vector.broadcast %cst_24 : f32 to vector<8x1xf32>
    %45 = arith.divf %43, %44 : vector<8x1xf32>
    %cst_25 = arith.constant 9.99999974E-6 : f32
    %46 = vector.broadcast %cst_25 : f32 to vector<8x1xf32>
    %47 = arith.addf %45, %46 : vector<8x1xf32>
    %48 = math.rsqrt %47 : vector<8x1xf32>
    %49 = vector.broadcast %48 : vector<8x1xf32> to vector<8x64xf32>
    %50 = arith.mulf %40, %49 : vector<8x64xf32>
    %c0_26 = arith.constant 0 : index
    %c0_27 = arith.constant 0 : index
    %51 = vector.load %arg10[%c0_26, %c0_27] : memref<1x64xf32, #tpu.memory_space<vmem>>, vector<1x64xf32>
    %52 = vector.broadcast %51 : vector<1x64xf32> to vector<8x64xf32>
    %53 = arith.mulf %50, %52 : vector<8x64xf32>
    %c0_28 = arith.constant 0 : index
    %c0_29 = arith.constant 0 : index
    %54 = vector.load %arg11[%c0_28, %c0_29] : memref<1x64xf32, #tpu.memory_space<vmem>>, vector<1x64xf32>
    %55 = vector.broadcast %54 : vector<1x64xf32> to vector<8x64xf32>
    %56 = arith.addf %53, %55 : vector<8x64xf32>
    %57 = math.tanh %56 : vector<8x64xf32>
    %c0_30 = arith.constant 0 : index
    %c0_31 = arith.constant 0 : index
    %58 = vector.load %arg3[%c0_30, %c0_31] : memref<8x8xf32, #tpu.memory_space<vmem>>, vector<8x8xf32>
    %c0_32 = arith.constant 0 : index
    %c0_33 = arith.constant 0 : index
    %59 = vector.load %arg12[%c0_32, %c0_33] : memref<64x128xf32, #tpu.memory_space<vmem>>, vector<64x128xf32>
    %cst_34 = arith.constant dense<0.000000e+00> : vector<8x128xf32>
    %60 = tpu.matmul %28, %59, %cst_34 {dimension_numbers = #tpu.dot_dimension_numbers<[1], [0], [0], [1], [0, 0, 1, 1], [], []>} : vector<8x64xf32>, vector<64x128xf32>, vector<8x128xf32> -> vector<8x128xf32>
    %c0_35 = arith.constant 0 : index
    %c0_36 = arith.constant 0 : index
    %61 = vector.load %arg13[%c0_35, %c0_36] : memref<64x128xf32, #tpu.memory_space<vmem>>, vector<64x128xf32>
    %cst_37 = arith.constant dense<0.000000e+00> : vector<8x128xf32>
    %62 = tpu.matmul %57, %61, %cst_37 {dimension_numbers = #tpu.dot_dimension_numbers<[1], [0], [0], [1], [0, 0, 1, 1], [], []>} : vector<8x64xf32>, vector<64x128xf32>, vector<8x128xf32> -> vector<8x128xf32>
    %63 = arith.addf %60, %62 : vector<8x128xf32>
    %c0_38 = arith.constant 0 : index
    %c0_39 = arith.constant 0 : index
    %64 = vector.load %arg14[%c0_38, %c0_39] : memref<8x128xf32, #tpu.memory_space<vmem>>, vector<8x128xf32>
    %cst_40 = arith.constant dense<0.000000e+00> : vector<8x128xf32>
    %65 = tpu.matmul %58, %64, %cst_40 {dimension_numbers = #tpu.dot_dimension_numbers<[1], [0], [0], [1], [0, 0, 1, 1], [], []>} : vector<8x8xf32>, vector<8x128xf32>, vector<8x128xf32> -> vector<8x128xf32>
    %66 = arith.addf %63, %65 : vector<8x128xf32>
    %c0_41 = arith.constant 0 : index
    %c0_42 = arith.constant 0 : index
    %67 = vector.load %arg15[%c0_41, %c0_42] : memref<1x128xf32, #tpu.memory_space<vmem>>, vector<1x128xf32>
    %68 = vector.broadcast %67 : vector<1x128xf32> to vector<8x128xf32>
    %69 = arith.addf %66, %68 : vector<8x128xf32>
    %cst_43 = arith.constant 0.000000e+00 : f32
    %70 = vector.broadcast %cst_43 : f32 to vector<8x128xf32>
    %71 = arith.maximumf %69, %70 : vector<8x128xf32>
    %c0_44 = arith.constant 0 : index
    %c0_45 = arith.constant 0 : index
    %72 = vector.load %arg16[%c0_44, %c0_45] : memref<128x128xf32, #tpu.memory_space<vmem>>, vector<128x128xf32>
    %cst_46 = arith.constant dense<0.000000e+00> : vector<8x128xf32>
    %73 = tpu.matmul %71, %72, %cst_46 {dimension_numbers = #tpu.dot_dimension_numbers<[1], [0], [0], [1], [0, 0, 1, 1], [], []>} : vector<8x128xf32>, vector<128x128xf32>, vector<8x128xf32> -> vector<8x128xf32>
    %c0_47 = arith.constant 0 : index
    %c0_48 = arith.constant 0 : index
    %74 = vector.load %arg17[%c0_47, %c0_48] : memref<1x128xf32, #tpu.memory_space<vmem>>, vector<1x128xf32>
    %75 = vector.broadcast %74 : vector<1x128xf32> to vector<8x128xf32>
    %76 = arith.addf %73, %75 : vector<8x128xf32>
    %cst_49 = arith.constant 0.000000e+00 : f32
    %77 = vector.broadcast %cst_49 : f32 to vector<8x128xf32>
    %78 = arith.maximumf %76, %77 : vector<8x128xf32>
    %c0_50 = arith.constant 0 : index
    %c0_51 = arith.constant 0 : index
    %79 = vector.load %arg18[%c0_50, %c0_51] : memref<128x1xf32, #tpu.memory_space<vmem>>, vector<128x1xf32>
    %cst_52 = arith.constant dense<0.000000e+00> : vector<8x1xf32>
    %80 = tpu.matmul %78, %79, %cst_52 {dimension_numbers = #tpu.dot_dimension_numbers<[1], [0], [0], [1], [0, 0, 1, 1], [], []>} : vector<8x128xf32>, vector<128x1xf32>, vector<8x1xf32> -> vector<8x1xf32>
    %c0_53 = arith.constant 0 : index
    %c0_54 = arith.constant 0 : index
    %81 = vector.load %arg19[%c0_53, %c0_54] : memref<1x1xf32, #tpu.memory_space<vmem>>, vector<1x1xf32>
    %82 = vector.broadcast %81 : vector<1x1xf32> to vector<8x1xf32>
    %83 = arith.addf %80, %82 : vector<8x1xf32>
    %c0_55 = arith.constant 0 : index
    %c0_56 = arith.constant 0 : index
    %84 = vector.load %arg28[%c0_55, %c0_56] : memref<8x1xf32, #tpu.memory_space<vmem>>, vector<8x1xf32>
    tpu.vector_store %arg28[%c0_55, %c0_56], %83 {strides = array<i32>} : memref<8x1xf32, #tpu.memory_space<vmem>>, vector<8x1xf32>,
    %c0_57 = arith.constant 0 : index
    %c0_58 = arith.constant 0 : index
    %85 = vector.load %arg20[%c0_57, %c0_58] : memref<64x128xf32, #tpu.memory_space<vmem>>, vector<64x128xf32>
    %cst_59 = arith.constant dense<0.000000e+00> : vector<8x128xf32>
    %86 = tpu.matmul %28, %85, %cst_59 {dimension_numbers = #tpu.dot_dimension_numbers<[1], [0], [0], [1], [0, 0, 1, 1], [], []>} : vector<8x64xf32>, vector<64x128xf32>, vector<8x128xf32> -> vector<8x128xf32>
    %c0_60 = arith.constant 0 : index
    %c0_61 = arith.constant 0 : index
    %87 = vector.load %arg21[%c0_60, %c0_61] : memref<64x128xf32, #tpu.memory_space<vmem>>, vector<64x128xf32>
    %cst_62 = arith.constant dense<0.000000e+00> : vector<8x128xf32>
    %88 = tpu.matmul %57, %87, %cst_62 {dimension_numbers = #tpu.dot_dimension_numbers<[1], [0], [0], [1], [0, 0, 1, 1], [], []>} : vector<8x64xf32>, vector<64x128xf32>, vector<8x128xf32> -> vector<8x128xf32>
    %89 = arith.addf %86, %88 : vector<8x128xf32>
    %c0_63 = arith.constant 0 : index
    %c0_64 = arith.constant 0 : index
    %90 = vector.load %arg22[%c0_63, %c0_64] : memref<8x128xf32, #tpu.memory_space<vmem>>, vector<8x128xf32>
    %cst_65 = arith.constant dense<0.000000e+00> : vector<8x128xf32>
    %91 = tpu.matmul %58, %90, %cst_65 {dimension_numbers = #tpu.dot_dimension_numbers<[1], [0], [0], [1], [0, 0, 1, 1], [], []>} : vector<8x8xf32>, vector<8x128xf32>, vector<8x128xf32> -> vector<8x128xf32>
    %92 = arith.addf %89, %91 : vector<8x128xf32>
    %c0_66 = arith.constant 0 : index
    %c0_67 = arith.constant 0 : index
    %93 = vector.load %arg23[%c0_66, %c0_67] : memref<1x128xf32, #tpu.memory_space<vmem>>, vector<1x128xf32>
    %94 = vector.broadcast %93 : vector<1x128xf32> to vector<8x128xf32>
    %95 = arith.addf %92, %94 : vector<8x128xf32>
    %cst_68 = arith.constant 0.000000e+00 : f32
    %96 = vector.broadcast %cst_68 : f32 to vector<8x128xf32>
    %97 = arith.maximumf %95, %96 : vector<8x128xf32>
    %c0_69 = arith.constant 0 : index
    %c0_70 = arith.constant 0 : index
    %98 = vector.load %arg24[%c0_69, %c0_70] : memref<128x128xf32, #tpu.memory_space<vmem>>, vector<128x128xf32>
    %cst_71 = arith.constant dense<0.000000e+00> : vector<8x128xf32>
    %99 = tpu.matmul %97, %98, %cst_71 {dimension_numbers = #tpu.dot_dimension_numbers<[1], [0], [0], [1], [0, 0, 1, 1], [], []>} : vector<8x128xf32>, vector<128x128xf32>, vector<8x128xf32> -> vector<8x128xf32>
    %c0_72 = arith.constant 0 : index
    %c0_73 = arith.constant 0 : index
    %100 = vector.load %arg25[%c0_72, %c0_73] : memref<1x128xf32, #tpu.memory_space<vmem>>, vector<1x128xf32>
    %101 = vector.broadcast %100 : vector<1x128xf32> to vector<8x128xf32>
    %102 = arith.addf %99, %101 : vector<8x128xf32>
    %cst_74 = arith.constant 0.000000e+00 : f32
    %103 = vector.broadcast %cst_74 : f32 to vector<8x128xf32>
    %104 = arith.maximumf %102, %103 : vector<8x128xf32>
    %c0_75 = arith.constant 0 : index
    %c0_76 = arith.constant 0 : index
    %105 = vector.load %arg26[%c0_75, %c0_76] : memref<128x1xf32, #tpu.memory_space<vmem>>, vector<128x1xf32>
    %cst_77 = arith.constant dense<0.000000e+00> : vector<8x1xf32>
    %106 = tpu.matmul %104, %105, %cst_77 {dimension_numbers = #tpu.dot_dimension_numbers<[1], [0], [0], [1], [0, 0, 1, 1], [], []>} : vector<8x128xf32>, vector<128x1xf32>, vector<8x1xf32> -> vector<8x1xf32>
    %c0_78 = arith.constant 0 : index
    %c0_79 = arith.constant 0 : index
    %107 = vector.load %arg27[%c0_78, %c0_79] : memref<1x1xf32, #tpu.memory_space<vmem>>, vector<1x1xf32>
    %108 = vector.broadcast %107 : vector<1x1xf32> to vector<8x1xf32>
    %109 = arith.addf %106, %108 : vector<8x1xf32>
    %c0_80 = arith.constant 0 : index
    %c0_81 = arith.constant 0 : index
    %110 = vector.load %arg29[%c0_80, %c0_81] : memref<8x1xf32, #tpu.memory_space<vmem>>, vector<8x1xf32>
    tpu.vector_store %arg29[%c0_80, %c0_81], %109 {strides = array<i32>} : memref<8x1xf32, #tpu.memory_space<vmem>>, vector<8x1xf32>,
    return
  }
  func.func @transform_0(%arg0: i32) -> (i32, i32) {
    %c0_i32 = arith.constant 0 : i32
    %c0_i32_0 = arith.constant 0 : i32
    return %arg0, %c0_i32 : i32, i32
  }
  func.func @transform_1(%arg0: i32) -> (i32, i32) {
    %c0_i32 = arith.constant 0 : i32
    %c0_i32_0 = arith.constant 0 : i32
    return %arg0, %c0_i32 : i32, i32
  }
  func.func @transform_2(%arg0: i32) -> (i32, i32) {
    %c0_i32 = arith.constant 0 : i32
    %c0_i32_0 = arith.constant 0 : i32
    return %arg0, %c0_i32 : i32, i32
  }
  func.func @transform_3(%arg0: i32) -> (i32, i32) {
    %c0_i32 = arith.constant 0 : i32
    %c0_i32_0 = arith.constant 0 : i32
    %c0_i32_1 = arith.constant 0 : i32
    return %c0_i32, %c0_i32_0 : i32, i32
  }
  func.func @transform_4(%arg0: i32) -> (i32, i32) {
    %c0_i32 = arith.constant 0 : i32
    %c0_i32_0 = arith.constant 0 : i32
    %c0_i32_1 = arith.constant 0 : i32
    return %c0_i32, %c0_i32_0 : i32, i32
  }
  func.func @transform_5(%arg0: i32) -> (i32, i32) {
    %c0_i32 = arith.constant 0 : i32
    %c0_i32_0 = arith.constant 0 : i32
    %c0_i32_1 = arith.constant 0 : i32
    return %c0_i32, %c0_i32_0 : i32, i32
  }
  func.func @transform_6(%arg0: i32) -> (i32, i32) {
    %c0_i32 = arith.constant 0 : i32
    %c0_i32_0 = arith.constant 0 : i32
    %c0_i32_1 = arith.constant 0 : i32
    return %c0_i32, %c0_i32_0 : i32, i32
  }
  func.func @transform_7(%arg0: i32) -> (i32, i32) {
    %c0_i32 = arith.constant 0 : i32
    %c0_i32_0 = arith.constant 0 : i32
    %c0_i32_1 = arith.constant 0 : i32
    return %c0_i32, %c0_i32_0 : i32, i32
  }
  func.func @transform_8(%arg0: i32) -> (i32, i32) {
    %c0_i32 = arith.constant 0 : i32
    %c0_i32_0 = arith.constant 0 : i32
    %c0_i32_1 = arith.constant 0 : i32
    return %c0_i32, %c0_i32_0 : i32, i32
  }
  func.func @transform_9(%arg0: i32) -> (i32, i32) {
    %c0_i32 = arith.constant 0 : i32
    %c0_i32_0 = arith.constant 0 : i32
    %c0_i32_1 = arith.constant 0 : i32
    return %c0_i32, %c0_i32_0 : i32, i32
  }
  func.func @transform_10(%arg0: i32) -> (i32, i32) {
    %c0_i32 = arith.constant 0 : i32
    %c0_i32_0 = arith.constant 0 : i32
    %c0_i32_1 = arith.constant 0 : i32
    return %c0_i32, %c0_i32_0 : i32, i32
  }
  func.func @transform_11(%arg0: i32) -> (i32, i32) {
    %c0_i32 = arith.constant 0 : i32
    %c0_i32_0 = arith.constant 0 : i32
    %c0_i32_1 = arith.constant 0 : i32
    return %c0_i32, %c0_i32_0 : i32, i32
  }
  func.func @transform_12(%arg0: i32) -> (i32, i32) {
    %c0_i32 = arith.constant 0 : i32
    %c0_i32_0 = arith.constant 0 : i32
    %c0_i32_1 = arith.constant 0 : i32
    return %c0_i32, %c0_i32_0 : i32, i32
  }
  func.func @transform_13(%arg0: i32) -> (i32, i32) {
    %c0_i32 = arith.constant 0 : i32
    %c0_i32_0 = arith.constant 0 : i32
    %c0_i32_1 = arith.constant 0 : i32
    return %c0_i32, %c0_i32_0 : i32, i32
  }
  func.func @transform_14(%arg0: i32) -> (i32, i32) {
    %c0_i32 = arith.constant 0 : i32
    %c0_i32_0 = arith.constant 0 : i32
    %c0_i32_1 = arith.constant 0 : i32
    return %c0_i32, %c0_i32_0 : i32, i32
  }
  func.func @transform_15(%arg0: i32) -> (i32, i32) {
    %c0_i32 = arith.constant 0 : i32
    %c0_i32_0 = arith.constant 0 : i32
    %c0_i32_1 = arith.constant 0 : i32
    return %c0_i32, %c0_i32_0 : i32, i32
  }
  func.func @transform_16(%arg0: i32) -> (i32, i32) {
    %c0_i32 = arith.constant 0 : i32
    %c0_i32_0 = arith.constant 0 : i32
    %c0_i32_1 = arith.constant 0 : i32
    return %c0_i32, %c0_i32_0 : i32, i32
  }
  func.func @transform_17(%arg0: i32) -> (i32, i32) {
    %c0_i32 = arith.constant 0 : i32
    %c0_i32_0 = arith.constant 0 : i32
    %c0_i32_1 = arith.constant 0 : i32
    return %c0_i32, %c0_i32_0 : i32, i32
  }
  func.func @transform_18(%arg0: i32) -> (i32, i32) {
    %c0_i32 = arith.constant 0 : i32
    %c0_i32_0 = arith.constant 0 : i32
    %c0_i32_1 = arith.constant 0 : i32
    return %c0_i32, %c0_i32_0 : i32, i32
  }
  func.func @transform_19(%arg0: i32) -> (i32, i32) {
    %c0_i32 = arith.constant 0 : i32
    %c0_i32_0 = arith.constant 0 : i32
    %c0_i32_1 = arith.constant 0 : i32
    return %c0_i32, %c0_i32_0 : i32, i32
  }
  func.func @transform_20(%arg0: i32) -> (i32, i32) {
    %c0_i32 = arith.constant 0 : i32
    %c0_i32_0 = arith.constant 0 : i32
    %c0_i32_1 = arith.constant 0 : i32
    return %c0_i32, %c0_i32_0 : i32, i32
  }
  func.func @transform_21(%arg0: i32) -> (i32, i32) {
    %c0_i32 = arith.constant 0 : i32
    %c0_i32_0 = arith.constant 0 : i32
    %c0_i32_1 = arith.constant 0 : i32
    return %c0_i32, %c0_i32_0 : i32, i32
  }
  func.func @transform_22(%arg0: i32) -> (i32, i32) {
    %c0_i32 = arith.constant 0 : i32
    %c0_i32_0 = arith.constant 0 : i32
    %c0_i32_1 = arith.constant 0 : i32
    return %c0_i32, %c0_i32_0 : i32, i32
  }
  func.func @transform_23(%arg0: i32) -> (i32, i32) {
    %c0_i32 = arith.constant 0 : i32
    %c0_i32_0 = arith.constant 0 : i32
    %c0_i32_1 = arith.constant 0 : i32
    return %c0_i32, %c0_i32_0 : i32, i32
  }
  func.func @transform_24(%arg0: i32) -> (i32, i32) {
    %c0_i32 = arith.constant 0 : i32
    %c0_i32_0 = arith.constant 0 : i32
    %c0_i32_1 = arith.constant 0 : i32
    return %c0_i32, %c0_i32_0 : i32, i32
  }
  func.func @transform_25(%arg0: i32) -> (i32, i32) {
    %c0_i32 = arith.constant 0 : i32
    %c0_i32_0 = arith.constant 0 : i32
    %c0_i32_1 = arith.constant 0 : i32
    return %c0_i32, %c0_i32_0 : i32, i32
  }
  func.func @transform_26(%arg0: i32) -> (i32, i32) {
    %c0_i32 = arith.constant 0 : i32
    %c0_i32_0 = arith.constant 0 : i32
    %c0_i32_1 = arith.constant 0 : i32
    return %c0_i32, %c0_i32_0 : i32, i32
  }
  func.func @transform_27(%arg0: i32) -> (i32, i32) {
    %c0_i32 = arith.constant 0 : i32
    %c0_i32_0 = arith.constant 0 : i32
    return %arg0, %c0_i32 : i32, i32
  }
  func.func @transform_28(%arg0: i32) -> (i32, i32) {
    %c0_i32 = arith.constant 0 : i32
    %c0_i32_0 = arith.constant 0 : i32
    return %arg0, %c0_i32 : i32, i32
  }
}

</mosaic_0001>

<bundles_post_ra>
// kernel: tpu_custom_call.1
= control target key start
LH: loop header
LB: loop body
LE: loop exit
PB: predicated region body
PF: predicated region fallthrough
CT: control target
= control target key end

     0   :  { %s2720_s0 = inlined_call_operand.hbm [shape: f32[8,128], index: 0, kind: input, shape index: {}]   ;;  %s2721_s1 = inlined_call_operand.hbm [shape: f32[8,16], index: 1, kind: input, shape index: {}]   ;;  %s2722_s2 = inlined_call_operand.hbm [shape: f32[8,8], index: 2, kind: input, shape index: {}]   ;;  %s2723_s3 = inlined_call_operand.vmem [shape: f32[128,64], index: 3, kind: input, shape index: {}]   ;;  %s2724_s4 = inlined_call_operand.hbm [shape: f32[1,64], index: 4, kind: input, shape index: {}]   ;;  %s2725_s5 = inlined_call_operand.hbm [shape: f32[1,64], index: 5, kind: input, shape index: {}]   ;;  %s2726_s6 = inlined_call_operand.hbm [shape: f32[1,64], index: 6, kind: input, shape index: {}]   ;;  %s2727_s7 = inlined_call_operand.vmem [shape: f32[16,64], index: 7, kind: input, shape index: {}]   ;;  %s2728_s8 = inlined_call_operand.hbm [shape: f32[1,64], index: 8, kind: input, shape index: {}]   ;;  %s2729_s9 = inlined_call_operand.hbm [shape: f32[1,64], index: 9, kind: input, shape index: {}]   ;;  %s2730_s10 = inlined_call_operand.hbm [shape: f32[1,64], index: 10, kind: input, shape index: {}]   ;;  %s2731_s11 = inlined_call_operand.vmem [shape: f32[64,128], index: 11, kind: input, shape index: {}]   ;;  %s2732_s12 = inlined_call_operand.vmem [shape: f32[64,128], index: 12, kind: input, shape index: {}]   ;;  %s2733_s13 = inlined_call_operand.vmem [shape: f32[8,128], index: 13, kind: input, shape index: {}]   ;;  %s2734_s14 = inlined_call_operand.vmem [shape: f32[1,128], index: 14, kind: input, shape index: {}]   ;;  %s2735_s15 = inlined_call_operand.vmem [shape: f32[128,128], index: 15, kind: input, shape index: {}]   ;;  %s2736_s16 = inlined_call_operand.hbm [shape: f32[1,128], index: 16, kind: input, shape index: {}]   ;;  %s2737_s17 = inlined_call_operand.vmem [shape: f32[128,1], index: 17, kind: input, shape index: {}]   ;;  %s2738_s18 = inlined_call_operand.<no memory space> [shape: f32[1,1], index: 18, kind: input, shape index: {}]   ;;  %s2739_s19 = inlined_call_operand.vmem [shape: f32[64,128], index: 19, kind: input, shape index: {}]   ;;  %s2740_s20 = inlined_call_operand.hbm [shape: f32[64,128], index: 20, kind: input, shape index: {}]   ;;  %s2741_s21 = inlined_call_operand.vmem [shape: f32[8,128], index: 21, kind: input, shape index: {}]   ;;  %s2742_s22 = inlined_call_operand.vmem [shape: f32[1,128], index: 22, kind: input, shape index: {}]   ;;  %s2743_s23 = inlined_call_operand.vmem [shape: f32[128,128], index: 23, kind: input, shape index: {}]   ;;  %s2744_s24 = inlined_call_operand.vmem [shape: f32[1,128], index: 24, kind: input, shape index: {}]   ;;  %s2745_s25 = inlined_call_operand.vmem [shape: f32[128,1], index: 25, kind: input, shape index: {}]   ;;  %s2746_s27 = inlined_call_operand.vmem [shape: f32[8,1], index: 27, kind: output, shape index: {0}]   ;;  %s2747_s28 = inlined_call_operand.vmem [shape: f32[8,1], index: 28, kind: output, shape index: {1}]   ;;  %s2748_s26 = inlined_call_operand.<no memory space> [shape: f32[1,1], index: 26, kind: input, shape index: {}]  }
   0x1   :  { %2753 = sst [smem:[#allocation27_spill]] %s2720_s0  ;;  %v34_v0 = vstv %s2738_s18  ;;  %v36_v1 = vstv %s2748_s26 }
   0x2   :  { %2754 = sst [smem:[#allocation28_spill]] %s2721_s1  ;;  %35 = vst [vmem:[#allocation2] sm:$0x1] %v34_v0  ;;  %37 = vst [vmem:[#allocation3] sm:$0x1] %v36_v1 }
   0x3   :  { %2755 = sst [smem:[#allocation29_spill]] %s2722_s2 }
   0x4   :  { %2756 = sst [smem:[#allocation30_spill]] %s2723_s3 }
   0x5   :  { %2757 = sst [smem:[#allocation31_spill]] %s2724_s4 }
   0x6   :  { %2758 = sst [smem:[#allocation32_spill]] %s2725_s5 }
   0x7   :  { %2759 = sst [smem:[#allocation33_spill]] %s2726_s6 }
   0x8   :  { %2760 = sst [smem:[#allocation34_spill]] %s2727_s7 }
   0x9   :  { %2761 = sst [smem:[#allocation35_spill]] %s2728_s8 }
   0xa   :  { %2762 = sst [smem:[#allocation36_spill]] %s2729_s9 }
   0xb   :  { %2763 = sst [smem:[#allocation37_spill]] %s2730_s10 }
   0xc   :  { %2764 = sst [smem:[#allocation38_spill]] %s2731_s11 }
   0xd   :  { %2765 = sst [smem:[#allocation39_spill]] %s2732_s12 }
   0xe   :  { %38 = vsyncpa [#allocation5], 0 }
   0xf   :  { %39 = vsyncpa [#allocation7], 0 }
  0x10   :  { %40 = vsyncpa [#allocation10], 0 }
  0x11   :  { %41 = vsyncpa [#allocation13], 0 }
  0x12   :  { %42 = vsyncpa [#allocation16], 0 }
  0x13   :  { %43 = vsyncpa [#allocation19], 0  ;;  %s2007_s3 = smov [#allocation6]   ;;  %s2008_s10 = smov [#allocation9]  }
  0x14   :  { %s60_s6 = sshll.u32 %s2007_s3, 4  ;;  %s82_s0 = sshll.u32 %s2008_s10, 4  ;;  %s61_s6 = int_to_ptr.vmem [resolvable:$true] %s60_s6  ;;  %s83_s0 = int_to_ptr.vmem [resolvable:$true] %s82_s0 }
  0x15   :  { %s1783_s11 = scalar_lea.vmem %s61_s6, 128  ;;  %p1788_p1 = scmp.lt.s32.totalorder %s61_s6, %s61_s6 }
  0x16   :  { %p1784_p0 = scmp.ne.s32.totalorder %s61_s6, %s1783_s11  ;;  %p1789_p2 = scmp.lt.s32.totalorder %s1783_s11, %s1783_s11 }
  0x18   :  { %p1790_p3 = por %p1789_p2, %p1788_p1 }
  0x1a   :  { %p1791_p4 = pnand %p1790_p3, %p1784_p0 }
  0x1c   :  { %1794 = shalt.err (!%p1791_p4)
}
  0x1d   :  { %s2766_s29 = sld [smem:[#allocation28_spill]]  ;;  %s1803_s2 = scalar_lea.vmem %s83_s0, 16 }
  0x1e   :  { %p1804_p5 = scmp.ne.s32.totalorder %s83_s0, %s1803_s2  ;;  %s1807_s7 = scalar_lea.vmem %s83_s0, 32 }
  0x1f   :  { %p1808_p6 = scmp.lt.s32.totalorder %s83_s0, %s83_s0  ;;  %p1809_p7 = scmp.lt.s32.totalorder %s1807_s7, %s1803_s2 }
  0x21   :  { %p1810_p8 = por %p1809_p7, %p1808_p6 }
  0x23   :  { %63 = dma.hbm_to_vmem [thread:$0]  %s2766_s29, 128, %s61_s6, [#allocation7]  }
  0x24   :  { %p1811_p9 = pnand %p1810_p8, %p1804_p5 }
  0x26   :  { %1814 = shalt.err (!%p1811_p9)
}
  0x27   :  { %s2767_s4 = sld [smem:[#allocation31_spill]]  ;;  %s2009_s8 = smov [#allocation12]  }
  0x28   :  { %s102_s5 = sshll.u32 %s2009_s8, 4  ;;  %s2010_s9 = smov [#allocation15]   ;;  %s103_s5 = int_to_ptr.vmem [resolvable:$true] %s102_s5 }
  0x29   :  { %s124_s30 = sshll.u32 %s2010_s9, 4  ;;  %s1823_s3 = scalar_lea.vmem %s103_s5, 16  ;;  %s125_s30 = int_to_ptr.vmem [resolvable:$true] %s124_s30 }
  0x2a   :  { %p1824_p10 = scmp.ne.s32.totalorder %s103_s5, %s1823_s3  ;;  %s1827_s6 = scalar_lea.vmem %s103_s5, 32 }
  0x2b   :  { %p1828_p11 = scmp.lt.s32.totalorder %s103_s5, %s103_s5  ;;  %p1829_p12 = scmp.lt.s32.totalorder %s1827_s6, %s1823_s3 }
  0x2d   :  { %85 = dma.hbm_to_vmem [thread:$0]  %s2767_s4, 16, %s83_s0, [#allocation10]  }
  0x2e   :  { %p1830_p13 = por %p1829_p12, %p1828_p11 }
  0x30   :  { %p1831_p0 = pnand %p1830_p13, %p1824_p10 }
  0x32   :  { %1834 = shalt.err (!%p1831_p0)
}
  0x33   :  { %s2768_s18 = sld [smem:[#allocation33_spill]]  ;;  %s1843_s26 = scalar_lea.vmem %s125_s30, 16 }
  0x34   :  { %p1844_p1 = scmp.ne.s32.totalorder %s125_s30, %s1843_s26  ;;  %s1847_s0 = scalar_lea.vmem %s125_s30, 32 }
  0x35   :  { %p1848_p2 = scmp.lt.s32.totalorder %s125_s30, %s125_s30  ;;  %p1849_p3 = scmp.lt.s32.totalorder %s1847_s0, %s1843_s26 }
  0x37   :  { %p1850_p4 = por %p1849_p3, %p1848_p2 }
  0x39   :  { %105 = dma.hbm_to_vmem [thread:$0]  %s2768_s18, 16, %s103_s5, [#allocation13]  }
  0x3a   :  { %p1851_p5 = pnand %p1850_p4, %p1844_p1 }
  0x3c   :  { %1854 = shalt.err (!%p1851_p5)
}
  0x3d   :  { %s2769_s7 = sld [smem:[#allocation36_spill]]  ;;  %s2011_s12 = smov [#allocation18]  }
  0x3e   :  { %s154_s1 = sshll.u32 %s2011_s12, 4  ;;  %s2012_s4 = smov [#allocation4]   ;;  %s155_s1 = int_to_ptr.vmem [resolvable:$true] %s154_s1 }
  0x3f   :  { %s50_s8 = sshll.u32 %s2012_s4, 4  ;;  %s1863_s9 = scalar_lea.vmem %s155_s1, 16  ;;  %s51_s8 = int_to_ptr.vmem [resolvable:$true] %s50_s8 }
  0x40   :  { %p1864_p6 = scmp.ne.s32.totalorder %s155_s1, %s1863_s9  ;;  %s1867_s5 = scalar_lea.vmem %s155_s1, 32 }
  0x41   :  { %p1868_p7 = scmp.lt.s32.totalorder %s155_s1, %s155_s1  ;;  %p1869_p8 = scmp.lt.s32.totalorder %s1867_s5, %s1863_s9 }
  0x43   :  { %127 = dma.hbm_to_vmem [thread:$0]  %s2769_s7, 16, %s125_s30, [#allocation16]  }
  0x44   :  { %p1870_p9 = por %p1869_p8, %p1868_p7 }
  0x46   :  { %p1871_p10 = pnand %p1870_p9, %p1864_p6 }
  0x48   :  { %1874 = shalt.err (!%p1871_p10)
}
  0x49   :  { %157 = dma.hbm_to_vmem [thread:$0]  %s2736_s16, 16, %s155_s1, [#allocation19]  }
  0x4a   :  { %s1883_s10 = scalar_lea.vmem %s51_s8, 128  ;;  %p1888_p12 = scmp.lt.s32.totalorder %s51_s8, %s51_s8 }
  0x4b   :  { %p1884_p11 = scmp.ne.s32.totalorder %s51_s8, %s1883_s10  ;;  %p1889_p13 = scmp.lt.s32.totalorder %s1883_s10, %s1883_s10 }
  0x4d   :  { %p1890_p0 = por %p1889_p13, %p1888_p12 }
  0x4f   :  { %p1891_p1 = pnand %p1890_p0, %p1884_p11 }
  0x51   :  { %1894 = shalt.err (!%p1891_p1)
}
  0x52   :  { %s2770_s18 = sld [smem:[#allocation27_spill]]  ;;  %s2013_s26 = smov [#allocation8]  }
  0x53   :  { %s70_s0 = sshll.u32 %s2013_s26, 4  ;;  %s2014_s29 = smov [#allocation11]   ;;  %s71_s0 = int_to_ptr.vmem [resolvable:$true] %s70_s0 }
  0x54   :  { %s92_s2 = sshll.u32 %s2014_s29, 4  ;;  %s1903_s7 = scalar_lea.vmem %s71_s0, 128  ;;  %s93_s2 = int_to_ptr.vmem [resolvable:$true] %s92_s2 }
  0x55   :  { %p1904_p2 = scmp.ne.s32.totalorder %s71_s0, %s1903_s7  ;;  %p1908_p3 = scmp.lt.s32.totalorder %s71_s0, %s71_s0 }
  0x56   :  { %p1909_p4 = scmp.lt.s32.totalorder %s1903_s7, %s1903_s7 }
  0x58   :  { %53 = dma.hbm_to_vmem [thread:$0]  %s2770_s18, 128, %s51_s8, [#allocation5]  }
  0x59   :  { %p1910_p5 = por %p1909_p4, %p1908_p3 }
  0x5b   :  { %p1911_p6 = pnand %p1910_p5, %p1904_p2 }
  0x5d   :  { %1914 = shalt.err (!%p1911_p6)
}
  0x5e   :  { %s2771_s1 = sld [smem:[#allocation29_spill]]  ;;  %s1923_s4 = scalar_lea.vmem %s93_s2, 16 }
  0x5f   :  { %p1924_p7 = scmp.ne.s32.totalorder %s93_s2, %s1923_s4  ;;  %s1927_s8 = scalar_lea.vmem %s93_s2, 32 }
  0x60   :  { %p1928_p8 = scmp.lt.s32.totalorder %s93_s2, %s93_s2  ;;  %p1929_p9 = scmp.lt.s32.totalorder %s1927_s8, %s1923_s4 }
  0x62   :  { %p1930_p10 = por %p1929_p9, %p1928_p8 }
  0x64   :  { %73 = dma.hbm_to_vmem [thread:$0]  %s2771_s1, 128, %s71_s0, [#allocation7]  }
  0x65   :  { %p1931_p11 = pnand %p1930_p10, %p1924_p7 }
  0x67   :  { %1934 = shalt.err (!%p1931_p11)
}
  0x68   :  { %s2772_s3 = sld [smem:[#allocation32_spill]]  ;;  %s2015_s6 = smov [#allocation14]  }
  0x69   :  { %s114_s10 = sshll.u32 %s2015_s6, 4  ;;  %s2016_s30 = smov [#allocation17]   ;;  %s115_s10 = int_to_ptr.vmem [resolvable:$true] %s114_s10 }
  0x6a   :  { %s134_s11 = sshll.u32 %s2016_s30, 4  ;;  %s1943_s18 = scalar_lea.vmem %s115_s10, 16  ;;  %s135_s11 = int_to_ptr.vmem [resolvable:$true] %s134_s11 }
  0x6b   :  { %p1944_p12 = scmp.ne.s32.totalorder %s115_s10, %s1943_s18  ;;  %s1947_s26 = scalar_lea.vmem %s115_s10, 32 }
  0x6c   :  { %p1948_p13 = scmp.lt.s32.totalorder %s115_s10, %s115_s10  ;;  %p1949_p0 = scmp.lt.s32.totalorder %s1947_s26, %s1943_s18 }
  0x6e   :  { %95 = dma.hbm_to_vmem [thread:$0]  %s2772_s3, 16, %s93_s2, [#allocation10]  }
  0x6f   :  { %p1950_p1 = por %p1949_p0, %p1948_p13 }
  0x71   :  { %p1951_p2 = pnand %p1950_p1, %p1944_p12 }
  0x73   :  { %1954 = shalt.err (!%p1951_p2)
}
  0x74   :  { %s2773_s7 = sld [smem:[#allocation35_spill]]  ;;  %s1963_s16 = scalar_lea.vmem %s135_s11, 16 }
  0x75   :  { %p1964_p3 = scmp.ne.s32.totalorder %s135_s11, %s1963_s16  ;;  %s1967_s2 = scalar_lea.vmem %s135_s11, 32 }
  0x76   :  { %p1968_p4 = scmp.lt.s32.totalorder %s135_s11, %s135_s11  ;;  %p1969_p5 = scmp.lt.s32.totalorder %s1967_s2, %s1963_s16 }
  0x78   :  { %p1970_p6 = por %p1969_p5, %p1968_p4 }
  0x7a   :  { %117 = dma.hbm_to_vmem [thread:$0]  %s2773_s7, 16, %s115_s10, [#allocation13]  }
  0x7b   :  { %p1971_p7 = pnand %p1970_p6, %p1964_p3 }
  0x7d   :  { %1974 = shalt.err (!%p1971_p7)
}
  0x7e   :  { %s2774_s4 = sld [smem:[#allocation37_spill]]  ;;  %s2017_s8 = smov [#allocation20]  }
  0x7f   :  { %s169_s9 = sshll.u32 %s2017_s8, 4  ;;  %s170_s9 = int_to_ptr.vmem [resolvable:$true] %s169_s9 }
  0x80   :  { %s1983_s5 = scalar_lea.vmem %s170_s9, 1024  ;;  %p1988_p9 = scmp.lt.s32.totalorder %s170_s9, %s170_s9 }
  0x81   :  { %p1984_p8 = scmp.ne.s32.totalorder %s170_s9, %s1983_s5  ;;  %p1989_p10 = scmp.lt.s32.totalorder %s1983_s5, %s1983_s5 }
  0x83   :  { %p1990_p11 = por %p1989_p10, %p1988_p9 }
  0x84   :  { %137 = dma.hbm_to_vmem [thread:$0]  %s2774_s4, 16, %s135_s11, [#allocation16]  }
  0x85   :  { %p1991_p12 = pnand %p1990_p11, %p1984_p8 }
  0x87   :  { %1994 = shalt.err (!%p1991_p12)
}
  0x88   :  { %s2018_s3 = smov 128   ;;  %s2019_s6 = smov 8  }
  0x89   :  { %175 = dma.hbm_to_vmem [thread:$0]  %s2740_s20, 1024, %s170_s9, [#allocation19], %s2018_s3, %s2018_s3, %s2019_s6  }
  0x8a   :  { %1995 = dma.done.wait [#allocation5], 128  }
  0x8b   :  { %1996 = vsyncadd [#allocation5], 4294967168 }
  0x8c   :  { %1997 = dma.done.wait [#allocation7], 256  }
  0x8d   :  { %1998 = vsyncadd [#allocation7], 4294967040 }
  0x8e   :  { %1999 = dma.done.wait [#allocation10], 32  }
  0x8f   :  { %2000 = vsyncadd [#allocation10], 4294967264 }
  0x90   :  { %2001 = dma.done.wait [#allocation13], 32  }
  0x91   :  { %2002 = vsyncadd [#allocation13], 4294967264 }
  0x92   :  { %2003 = dma.done.wait [#allocation16], 32  }
  0x93   :  { %2004 = vsyncadd [#allocation16], 4294967264 }
  0x94   :  { %2005 = dma.done.wait [#allocation19], 1040  }
  0x95   :  { %2006 = vsyncadd [#allocation19], 4294966256  ;;  %v2020_v2 = vmov 0.0   ;;  %vm2021_vm0 = vmmov 0   ;;  %s2775_s18 = sld [smem:[#allocation30_spill]]  ;;  %v347_v7 = vld [vmem:[#allocation6] sm:$0xff] }
  0x96   :  { %1484 = vmatprep.subr.mxu0 %v2020_v2  ;;  %1519 = vmatprep.subr.mxu1 %v2020_v2  ;;  %s2776_s29 = sld [smem:[#allocation34_spill]]  ;;  %vm357_vm1 = vcmask 130048   ;;  %v221_v22 = vld [vmem:[#allocation4] sm:$0xff]  ;;  %v1340_v23 = vld [vmem:[#allocation14] ss:$0 sm:$0xff]  ;;  %vm315_vm2 = vcmask 523264  }
  0x97   :  { %1523 = vmatprep.mubr.msk.f32.mxu1 %vm2021_vm0, %v2020_v2  ;;  %1516 = vmatprep.mubr.msk.f32.mxu0 %vm2021_vm0, %v2020_v2  ;;  %v1337_v28 = vld [vmem:[#allocation9] ss:$0 sm:$0xff]  ;;  %s2777_s26 = sld [smem:[#allocation39_spill]]  ;;  %v624_v51 = vld [vmem:[%s2733_s13] sm:$0xff]  ;;  %v2332_v52 = vld [vmem:[#allocation8] sm:$0xff]  ;;  %vm625_vm3 = vcmask 64512  }
  0x98   :  { %v1342_v57 = vld [vmem:[#allocation15] ss:$0 sm:$0xff]  ;;  %v1343_v59 = vld [vmem:[#allocation17] ss:$0 sm:$0xff]  ;;  %s2778_s11 = sld [smem:[#allocation38_spill]]  ;;  %vm896_vm4 = vcmask 7168  }
  0x9b   :  { %v237_v3 = vld [vmem:[%s2775_s18 + $0x78] sm:$0xff]  ;;  %v236_v5 = vld [vmem:[%s2775_s18 + $0x70] sm:$0xff]  ;;  %v235_v8 = vld [vmem:[%s2775_s18 + $0x68] sm:$0xff] }
  0x9c   :  { %v349_v4 = vld [vmem:[%s2776_s29 + $0x8] sm:$0xff]  ;;  %1485 = vmatpush3.msra.mxu0 %v237_v3  ;;  %v348_v6 = vld [vmem:[%s2776_s29] sm:$0xff]  ;;  %v233_v10 = vld [vmem:[%s2775_s18 + $0x58] sm:$0xff] }
  0x9d   :  { %1520 = vmatpush3.msra.mxu1 %v349_v4  ;;  %1486 = vmatprep.subr.mxu0 %v2020_v2  ;;  %v234_v9 = vld [vmem:[%s2775_s18 + $0x60] sm:$0xff]  ;;  %v232_v11 = vld [vmem:[%s2775_s18 + $0x50] sm:$0xff]  ;;  %v231_v12 = vld [vmem:[%s2775_s18 + $0x48] sm:$0xff] }
  0x9e   :  { %1521 = vmatprep.subr.mxu1 %v2020_v2  ;;  %1487 = vmatpush3.msra.mxu0 %v236_v5  ;;  %v230_v13 = vld [vmem:[%s2775_s18 + $0x40] sm:$0xff]  ;;  %v229_v14 = vld [vmem:[%s2775_s18 + $0x38] sm:$0xff]  ;;  %v228_v15 = vld [vmem:[%s2775_s18 + $0x30] sm:$0xff] }
  0x9f   :  { %1522 = vmatpush3.msra.mxu1 %v348_v6  ;;  %1488 = vmatprep.subr.mxu0 %v2020_v2  ;;  %v227_v16 = vld [vmem:[%s2775_s18 + $0x28] sm:$0xff]  ;;  %v226_v17 = vld [vmem:[%s2775_s18 + $0x20] sm:$0xff]  ;;  %v225_v18 = vld [vmem:[%s2775_s18 + $0x18] sm:$0xff] }
  0xa0   :  { %1524 = vmatmul.mubr.msk.f32.vlgmr.msra.gmra.mxu1 %vm357_vm1, %v347_v7  ;;  %1489 = vmatpush3.msra.mxu0 %v235_v8  ;;  %v224_v19 = vld [vmem:[%s2775_s18 + $0x10] sm:$0xff]  ;;  %v223_v20 = vld [vmem:[%s2775_s18 + $0x8] sm:$0xff]  ;;  %v222_v21 = vld [vmem:[%s2775_s18] sm:$0xff] }
  0xa1   :  { %1526 = vmatprep.subr.mxu1 %v2020_v2  ;;  %1490 = vmatprep.subr.mxu0 %v2020_v2  ;;  %v477_v43 = vld [vmem:[%s2777_s26 + $0x38] sm:$0xff]  ;;  %v476_v44 = vld [vmem:[%s2777_s26 + $0x30] sm:$0xff]  ;;  %v475_v45 = vld [vmem:[%s2777_s26 + $0x28] sm:$0xff] }
  0xa2   :  { %1542 = vmatprep.mubr.msk.f32.mxu1 %vm2021_vm0, %v2020_v2  ;;  %1491 = vmatpush3.msra.mxu0 %v234_v9  ;;  %v474_v46 = vld [vmem:[%s2777_s26 + $0x20] sm:$0xff]  ;;  %v473_v47 = vld [vmem:[%s2777_s26 + $0x18] sm:$0xff]  ;;  %v472_v48 = vld [vmem:[%s2777_s26 + $0x10] sm:$0xff] }
  0xa3   :  { %1492 = vmatprep.subr.mxu0 %v2020_v2  ;;  %1527 = vmatpush3.msra.mxu1 %v477_v43  ;;  %v471_v49 = vld [vmem:[%s2777_s26 + $0x8] sm:$0xff]  ;;  %v470_v50 = vld [vmem:[%s2777_s26] sm:$0xff]  ;;  %v469_v1 = vld [vmem:[%s2778_s11 + $0x38] sm:$0xff] }
  0xa4   :  { %1493 = vmatpush3.msra.mxu0 %v233_v10  ;;  %1528 = vmatprep.subr.mxu1 %v2020_v2  ;;  %v468_v4 = vld [vmem:[%s2778_s11 + $0x30] sm:$0xff]  ;;  %v467_v5 = vld [vmem:[%s2778_s11 + $0x28] sm:$0xff]  ;;  %v466_v6 = vld [vmem:[%s2778_s11 + $0x20] sm:$0xff] }
  0xa5   :  { %1494 = vmatprep.subr.mxu0 %v2020_v2  ;;  %1529 = vmatpush3.msra.mxu1 %v476_v44  ;;  %v465_v7 = vld [vmem:[%s2778_s11 + $0x18] sm:$0xff]  ;;  %v811_v43 = vld [vmem:[%s2737_s17 + $0x40] sm:$0xff] }
  0xa6   :  { %1495 = vmatpush3.msra.mxu0 %v232_v11  ;;  %1530 = vmatprep.subr.mxu1 %v2020_v2  ;;  %v1338_v9 = vld [vmem:[#allocation11] ss:$0 sm:$0xff]  ;;  %v464_v11 = vld [vmem:[%s2778_s11 + $0x10] sm:$0xff] }
  0xa7   :  { %1496 = vmatprep.subr.mxu0 %v2020_v2  ;;  %1531 = vmatpush3.msra.mxu1 %v475_v45  ;;  %v810_v44 = vld [vmem:[%s2737_s17 + $0x38] sm:$0xff]  ;;  %v809_v45 = vld [vmem:[%s2737_s17 + $0x30] sm:$0xff] }
  0xa8   :  { %1497 = vmatpush3.msra.mxu0 %v231_v12  ;;  %1532 = vmatprep.subr.mxu1 %v2020_v2  ;;  %v1339_v12 = vld [vmem:[#allocation12] ss:$0 sm:$0xff] }
  0xa9   :  { %1498 = vmatprep.subr.mxu0 %v2020_v2  ;;  %1533 = vmatpush3.msra.mxu1 %v474_v46  ;;  %v808_v46 = vld [vmem:[%s2737_s17 + $0x28] sm:$0xff] }
  0xaa   :  { %1499 = vmatpush3.msra.mxu0 %v230_v13  ;;  %1534 = vmatprep.subr.mxu1 %v2020_v2 }
  0xab   :  { %1500 = vmatprep.subr.mxu0 %v2020_v2  ;;  %1535 = vmatpush3.msra.mxu1 %v473_v47  ;;  %v807_v47 = vld [vmem:[%s2737_s17 + $0x20] sm:$0xff] }
  0xac   :  { %1501 = vmatpush3.msra.mxu0 %v229_v14  ;;  %1536 = vmatprep.subr.mxu1 %v2020_v2  ;;  %v463_v14 = vld [vmem:[%s2778_s11 + $0x8] sm:$0xff] }
  0xad   :  { %1502 = vmatprep.subr.mxu0 %v2020_v2  ;;  %1537 = vmatpush3.msra.mxu1 %v472_v48  ;;  %v806_v48 = vld [vmem:[%s2737_s17 + $0x18] sm:$0xff] }
  0xae   :  { %1503 = vmatpush3.msra.mxu0 %v228_v15  ;;  %1538 = vmatprep.subr.mxu1 %v2020_v2 }
  0xaf   :  { %1504 = vmatprep.subr.mxu0 %v2020_v2  ;;  %1539 = vmatpush3.msra.mxu1 %v471_v49  ;;  %v805_v49 = vld [vmem:[%s2737_s17 + $0x10] sm:$0xff] }
  0xb0   :  { %1505 = vmatpush3.msra.mxu0 %v227_v16  ;;  %1540 = vmatprep.subr.mxu1 %v2020_v2  ;;  %v462_v16 = vld [vmem:[%s2778_s11] sm:$0xff] }
  0xb1   :  { %1506 = vmatprep.subr.mxu0 %v2020_v2  ;;  %1541 = vmatpush3.msra.mxu1 %v470_v50 }
  0xb2   :  { %1507 = vmatpush3.msra.mxu0 %v226_v17  ;;  %1545 = vmatprep.subr.mxu1 %v2020_v2 }
  0xb3   :  { %1508 = vmatprep.subr.mxu0 %v2020_v2 }
  0xb4   :  { %1509 = vmatpush3.msra.mxu0 %v225_v18  ;;  %v724_v18 = vld [vmem:[%s2735_s15 + $0x78] sm:$0xff] }
  0xb5   :  { %1510 = vmatprep.subr.mxu0 %v2020_v2 }
  0xb6   :  { %1511 = vmatpush3.msra.mxu0 %v224_v19  ;;  %v723_v19 = vld [vmem:[%s2735_s15 + $0x70] sm:$0xff] }
  0xb7   :  { %1512 = vmatprep.subr.mxu0 %v2020_v2 }
  0xb8   :  { %1513 = vmatpush3.msra.mxu0 %v223_v20  ;;  %v722_v20 = vld [vmem:[%s2735_s15 + $0x68] sm:$0xff] }
  0xb9   :  { %1514 = vmatprep.subr.mxu0 %v2020_v2 }
  0xba   :  { %1515 = vmatpush3.msra.mxu0 %v222_v21  ;;  %v721_v21 = vld [vmem:[%s2735_s15 + $0x60] sm:$0xff] }
  0xbb   :  { %1517 = vmatmul.mubr.f32.vlgmr.msra.gmra.mxu0 %v221_v22  ;;  %1564 = vmatprep.subr.mxu0 %v2020_v2  ;;  %v720_v22 = vld [vmem:[%s2735_s15 + $0x58] sm:$0xff] }
  0xbc   :  { %1566 = vmatprep.mubr.msk.f32.mxu0 %vm2021_vm0, %v2020_v2  ;;  %1565 = vmatpush3.msra.mxu0 %v624_v51 }
  0xbd   :  { %1569 = vmatprep.subr.mxu0 %v2020_v2 }
  0xbf   :  { %1567 = vmatmul.mubr.msk.f32.vlgmr.msra.gmra.mxu0 %vm625_vm3, %v2332_v52 }
  0xc0   :  { %1601 = vmatprep.mubr.msk.f32.mxu0 %vm2021_vm0, %v2020_v2  ;;  %1570 = vmatpush3.msra.mxu0 %v724_v18  ;;  %v900_v18 = vld [vmem:[%s2739_s19 + $0x10] sm:$0xff] }
  0xc1   :  { %1571 = vmatprep.subr.mxu0 %v2020_v2 }
  0xc2   :  { %1572 = vmatpush3.msra.mxu0 %v723_v19  ;;  %v899_v19 = vld [vmem:[%s2739_s19 + $0x8] sm:$0xff] }
  0xc3   :  { %1573 = vmatprep.subr.mxu0 %v2020_v2 }
  0xc4   :  { %1574 = vmatpush3.msra.mxu0 %v722_v20 }
  0xc5   :  { %1575 = vmatprep.subr.mxu0 %v2020_v2 }
  0xc6   :  { %1576 = vmatpush3.msra.mxu0 %v721_v21  ;;  %v898_v21 = vld [vmem:[%s2739_s19] sm:$0xff] }
  0xc7   :  { %1577 = vmatprep.subr.mxu0 %v2020_v2 }
  0xc8   :  { %1578 = vmatpush3.msra.mxu0 %v720_v22 }
  0xc9   :  { %1579 = vmatprep.subr.mxu0 %v2020_v2 }
 0x160   :  { %v427_v24 = vpop.f32.mrf.mxu1 }
 0x161   :  { %v428_v25 = vadd.f32 %v1340_v23, %v427_v24  ;;  %v719_v23 = vld [vmem:[%s2735_s15 + $0x50] sm:$0xff]  ;;  %v718_v24 = vld [vmem:[%s2735_s15 + $0x48] sm:$0xff] }
 0x162   :  { %v1525_v26 = vpop.f32.mrf.mxu1  ;;  %1580 = vmatpush3.msra.mxu0 %v719_v23  ;;  %v1150_v23 = vld [vmem:[%s2743_s23 + $0x78] sm:$0xff] }
 0x163   :  { %v431_v27 = vsel %vm315_vm2, %v428_v25, 0.0  ;;  %1581 = vmatprep.subr.mxu0 %v2020_v2  ;;  %v716_v26 = vld [vmem:[%s2735_s15 + $0x38] sm:$0xff] }
 0x164   :  { %432 = vadd.xlane.f32.xlu0 %v431_v27  ;;  %1582 = vmatpush3.msra.mxu0 %v718_v24  ;;  %v715_v27 = vld [vmem:[%s2735_s15 + $0x30] sm:$0xff] }
 0x165   :  { %1583 = vmatprep.subr.mxu0 %v2020_v2  ;;  %v1149_v24 = vld [vmem:[%s2743_s23 + $0x70] sm:$0xff] }
 0x17b   :  { %v311_v29 = vpop.f32.mrf.mxu0 }
 0x17c   :  { %v312_v30 = vadd.f32 %v1337_v28, %v311_v29  ;;  %v714_v28 = vld [vmem:[%s2735_s15 + $0x28] sm:$0xff]  ;;  %v713_v29 = vld [vmem:[%s2735_s15 + $0x20] sm:$0xff] }
 0x17d   :  { %v1518_v31 = vpop.f32.mrf.mxu0 }
 0x17e   :  { %v316_v32 = vsel %vm315_vm2, %v312_v30, 0.0  ;;  %v712_v31 = vld [vmem:[%s2735_s15 + $0x18] sm:$0xff] }
 0x17f   :  { %317 = vadd.xlane.f32.xlu0 %v316_v32 }
 0x1ed   :  { %v433_v33 = vpop.xlane.xlu0 %432 }
 0x1ee   :  { %v434_v34 = vmul.f32 0.015625, %v433_v33  ;;  %v711_v33 = vld [vmem:[%s2735_s15 + $0x10] sm:$0xff] }
 0x1f0   :  { %v435_v35 = vsub.f32 %v428_v25, %v434_v34  ;;  %v717_v25 = vld [vmem:[%s2735_s15 + $0x40] sm:$0xff]  ;;  %v710_v34 = vld [vmem:[%s2735_s15 + $0x8] sm:$0xff] }
 0x1f1   :  { %1584 = vmatpush3.msra.mxu0 %v717_v25  ;;  %v1148_v25 = vld [vmem:[%s2743_s23 + $0x68] sm:$0xff] }
 0x1f2   :  { %v436_v36 = vmul.f32 %v435_v35, %v435_v35  ;;  %1585 = vmatprep.subr.mxu0 %v2020_v2 }
 0x1f3   :  { %1586 = vmatpush3.msra.mxu0 %v716_v26  ;;  %v1146_v26 = vld [vmem:[%s2743_s23 + $0x58] sm:$0xff] }
 0x1f4   :  { %v437_v37 = vsel %vm315_vm2, %v436_v36, 0.0  ;;  %1587 = vmatprep.subr.mxu0 %v2020_v2  ;;  %v818_v36 = vld [vmem:[%s2737_s17 + $0x78] sm:$0xff] }
 0x1f5   :  { %438 = vadd.xlane.f32.xlu1 %v437_v37  ;;  %1588 = vmatpush3.msra.mxu0 %v715_v27  ;;  %v817_v37 = vld [vmem:[%s2737_s17 + $0x70] sm:$0xff] }
 0x1f6   :  { %1589 = vmatprep.subr.mxu0 %v2020_v2  ;;  %v1145_v27 = vld [vmem:[%s2743_s23 + $0x50] sm:$0xff] }
 0x1f7   :  { %1590 = vmatpush3.msra.mxu0 %v714_v28  ;;  %v1144_v28 = vld [vmem:[%s2743_s23 + $0x48] sm:$0xff] }
 0x1f8   :  { %1591 = vmatprep.subr.mxu0 %v2020_v2 }
 0x1f9   :  { %1592 = vmatpush3.msra.mxu0 %v713_v29  ;;  %v1143_v29 = vld [vmem:[%s2743_s23 + $0x40] sm:$0xff] }
 0x1fa   :  { %1593 = vmatprep.subr.mxu0 %v2020_v2 }
 0x1fb   :  { %1594 = vmatpush3.msra.mxu0 %v712_v31  ;;  %v1141_v31 = vld [vmem:[%s2743_s23 + $0x30] sm:$0xff] }
 0x1fc   :  { %1595 = vmatprep.subr.mxu0 %v2020_v2 }
 0x1fd   :  { %1596 = vmatpush3.msra.mxu0 %v711_v33  ;;  %v1139_v33 = vld [vmem:[%s2743_s23 + $0x20] sm:$0xff] }
 0x1fe   :  { %1597 = vmatprep.subr.mxu0 %v2020_v2 }
 0x1ff   :  { %1598 = vmatpush3.msra.mxu0 %v710_v34 }
 0x200   :  { %1599 = vmatprep.subr.mxu0 %v2020_v2 }
 0x208   :  { %v318_v38 = vpop.xlane.xlu0 %317 }
 0x209   :  { %v320_v39 = vmul.f32 0.015625, %v318_v38  ;;  %v816_v38 = vld [vmem:[%s2737_s17 + $0x68] sm:$0xff] }
 0x20b   :  { %v2291_v40 = vsub.f32 %v312_v30, %v320_v39  ;;  %v695_v30 = vpop.f32.mrf.mxu0  ;;  %v815_v39 = vld [vmem:[%s2737_s17 + $0x60] sm:$0xff] }
 0x20d   :  { %v322_v41 = vmul.f32 %v2291_v40, %v2291_v40  ;;  %v1568_v32 = vpop.f32.mrf.mxu0 }
 0x20e   :  { %v1140_v32 = vld [vmem:[%s2743_s23 + $0x28] sm:$0xff] }
 0x20f   :  { %v323_v42 = vsel %vm315_vm2, %v322_v41, 0.0  ;;  %v813_v41 = vld [vmem:[%s2737_s17 + $0x50] sm:$0xff] }
 0x210   :  { %324 = vadd.xlane.f32.xlu1 %v323_v42  ;;  %v812_v42 = vld [vmem:[%s2737_s17 + $0x48] sm:$0xff] }
 0x27e   :  { %v439_v53 = vpop.xlane.xlu1 %438 }
 0x27f   :  { %v440_v54 = vmul.f32 0.015625, %v439_v53 }
 0x281   :  { %v441_v55 = vadd.f32 1e-05, %v440_v54 }
 0x283   :  { %1767 = vrsqrt.f32 %v441_v55  ;;  %v1347_v55 = vld [vmem:[%s2734_s14] ss:$0 sm:$0xff] }
 0x290   :  { %v1768_v56 = vpop.eup %1767 }
 0x291   :  { %v443_v58 = vmul.f32 %v1768_v56, %v435_v35  ;;  %v709_v35 = vld [vmem:[%s2735_s15] sm:$0xff] }
 0x292   :  { %1600 = vmatpush3.msra.mxu0 %v709_v35  ;;  %v1138_v35 = vld [vmem:[%s2743_s23 + $0x18] sm:$0xff] }
 0x293   :  { %v451_v60 = vmul.f32 %v1342_v57, %v443_v58  ;;  %1639 = vmatprep.subr.mxu0 %v2020_v2 }
 0x295   :  { %v459_v61 = vadd.f32 %v1343_v59, %v451_v60  ;;  %v913_v60 = vld [vmem:[#allocation20 + $0x38] sm:$0xff] }
 0x297   :  { %1769 = vtanh.f32 %v459_v61  ;;  %v912_v61 = vld [vmem:[#allocation20 + $0x30] sm:$0xff] }
 0x299   :  { %v325_v62 = vpop.xlane.xlu1 %324 }
 0x29a   :  { %v326_v63 = vmul.f32 0.015625, %v325_v62  ;;  %v911_v62 = vld [vmem:[#allocation20 + $0x28] sm:$0xff] }
 0x29c   :  { %v327_v0 = vadd.f32 1e-05, %v326_v63  ;;  %v910_v63 = vld [vmem:[#allocation20 + $0x20] sm:$0xff] }
 0x29e   :  { %1771 = vrsqrt.f32 %v327_v0  ;;  %v909_v0 = vld [vmem:[#allocation20 + $0x18] sm:$0xff] }
 0x2a4   :  { %v2341_v3 = vpop.eup %1769 }
 0x2a5   :  { %1543 = vmatmul.mubr.msk.f32.vlgmr.msra.gmra.mxu1 %vm315_vm2, %v2341_v3 }
 0x2a6   :  { %1546 = vmatpush3.msra.mxu1 %v469_v1  ;;  %1561 = vmatprep.mubr.msk.f32.mxu1 %vm2021_vm0, %v2020_v2  ;;  %v908_v1 = vld [vmem:[#allocation20 + $0x10] sm:$0xff] }
 0x2a7   :  { %1547 = vmatprep.subr.mxu1 %v2020_v2 }
 0x2a8   :  { %1548 = vmatpush3.msra.mxu1 %v468_v4  ;;  %v907_v4 = vld [vmem:[#allocation20 + $0x8] sm:$0xff] }
 0x2a9   :  { %1549 = vmatprep.subr.mxu1 %v2020_v2 }
 0x2aa   :  { %1550 = vmatpush3.msra.mxu1 %v467_v5  ;;  %v906_v5 = vld [vmem:[#allocation20] sm:$0xff] }
 0x2ab   :  { %1551 = vmatprep.subr.mxu1 %v2020_v2  ;;  %v1772_v8 = vpop.eup %1771 }
 0x2ac   :  { %1552 = vmatpush3.msra.mxu1 %v466_v6  ;;  %v329_v10 = vmul.f32 %v1772_v8, %v2291_v40  ;;  %v814_v40 = vld [vmem:[%s2737_s17 + $0x58] sm:$0xff]  ;;  %v804_v6 = vld [vmem:[%s2737_s17 + $0x8] sm:$0xff]  ;;  %v1348_v8 = vld [vmem:[#allocation18] ss:$0 sm:$0xff] }
 0x2ad   :  { %1553 = vmatprep.subr.mxu1 %v2020_v2 }
 0x2ae   :  { %1554 = vmatpush3.msra.mxu1 %v465_v7  ;;  %v337_v13 = vmul.f32 %v1338_v9, %v329_v10  ;;  %v803_v7 = vld [vmem:[%s2737_s17] sm:$0xff] }
 0x2af   :  { %1555 = vmatprep.subr.mxu1 %v2020_v2 }
 0x2b0   :  { %1556 = vmatpush3.msra.mxu1 %v464_v11  ;;  %v345_v15 = vadd.f32 %v1339_v12, %v337_v13  ;;  %v905_v13 = vld [vmem:[%s2739_s19 + $0x38] sm:$0xff] }
 0x2b1   :  { %1557 = vmatprep.subr.mxu1 %v2020_v2 }
 0x2b2   :  { %1558 = vmatpush3.msra.mxu1 %v463_v14  ;;  %1773 = vtanh.f32 %v345_v15  ;;  %v904_v14 = vld [vmem:[%s2739_s19 + $0x30] sm:$0xff]  ;;  %v902_v15 = vld [vmem:[%s2739_s19 + $0x20] sm:$0xff] }
 0x2b3   :  { %1559 = vmatprep.subr.mxu1 %v2020_v2 }
 0x2b4   :  { %1560 = vmatpush3.msra.mxu1 %v462_v16  ;;  %v901_v16 = vld [vmem:[%s2739_s19 + $0x18] sm:$0xff] }
 0x2b5   :  { %1604 = vmatprep.subr.mxu1 %v2020_v2 }
 0x2bf   :  { %v2377_v17 = vpop.eup %1773 }
 0x2c0   :  { %1562 = vmatmul.mubr.msk.f32.vlgmr.msra.gmra.mxu1 %vm315_vm2, %v2377_v17 }
 0x2c1   :  { %1636 = vmatprep.mubr.msk.f32.mxu1 %vm2021_vm0, %v2020_v2  ;;  %1605 = vmatpush3.msra.mxu1 %v818_v36 }
 0x2c2   :  { %1606 = vmatprep.subr.mxu1 %v2020_v2 }
 0x2c3   :  { %1607 = vmatpush3.msra.mxu1 %v817_v37  ;;  %v1137_v37 = vld [vmem:[%s2743_s23 + $0x10] sm:$0xff] }
 0x2c4   :  { %1608 = vmatprep.subr.mxu1 %v2020_v2 }
 0x2c5   :  { %1609 = vmatpush3.msra.mxu1 %v816_v38  ;;  %v1136_v38 = vld [vmem:[%s2743_s23 + $0x8] sm:$0xff] }
 0x2c6   :  { %1610 = vmatprep.subr.mxu1 %v2020_v2 }
 0x2c7   :  { %1611 = vmatpush3.msra.mxu1 %v815_v39  ;;  %v1135_v39 = vld [vmem:[%s2743_s23] sm:$0xff] }
 0x2c8   :  { %1612 = vmatprep.subr.mxu1 %v2020_v2 }
 0x2c9   :  { %1613 = vmatpush3.msra.mxu1 %v814_v40  ;;  %v1244_v40 = vld [vmem:[%s2745_s25 + $0x78] sm:$0xff] }
 0x2ca   :  { %1614 = vmatprep.subr.mxu1 %v2020_v2 }
 0x2cb   :  { %1615 = vmatpush3.msra.mxu1 %v813_v41  ;;  %v1243_v41 = vld [vmem:[%s2745_s25 + $0x70] sm:$0xff] }
 0x2cc   :  { %1616 = vmatprep.subr.mxu1 %v2020_v2 }
 0x2cd   :  { %1617 = vmatpush3.msra.mxu1 %v812_v42  ;;  %v1242_v42 = vld [vmem:[%s2745_s25 + $0x68] sm:$0xff] }
 0x2ce   :  { %1618 = vmatprep.subr.mxu1 %v2020_v2 }
 0x2cf   :  { %1619 = vmatpush3.msra.mxu1 %v811_v43  ;;  %v1241_v43 = vld [vmem:[%s2745_s25 + $0x60] sm:$0xff] }
 0x2d0   :  { %1620 = vmatprep.subr.mxu1 %v2020_v2 }
 0x2d1   :  { %1621 = vmatpush3.msra.mxu1 %v810_v44  ;;  %v1240_v44 = vld [vmem:[%s2745_s25 + $0x58] sm:$0xff] }
 0x2d2   :  { %1622 = vmatprep.subr.mxu1 %v2020_v2 }
 0x2d3   :  { %1623 = vmatpush3.msra.mxu1 %v809_v45  ;;  %v1239_v45 = vld [vmem:[%s2745_s25 + $0x50] sm:$0xff] }
 0x2d4   :  { %1624 = vmatprep.subr.mxu1 %v2020_v2 }
 0x2d5   :  { %1625 = vmatpush3.msra.mxu1 %v808_v46  ;;  %v1238_v46 = vld [vmem:[%s2745_s25 + $0x48] sm:$0xff] }
 0x2d6   :  { %1626 = vmatprep.subr.mxu1 %v2020_v2 }
 0x2d7   :  { %1627 = vmatpush3.msra.mxu1 %v807_v47  ;;  %v1237_v47 = vld [vmem:[%s2745_s25 + $0x40] sm:$0xff] }
 0x2d8   :  { %1628 = vmatprep.subr.mxu1 %v2020_v2 }
 0x2d9   :  { %1629 = vmatpush3.msra.mxu1 %v806_v48  ;;  %v1236_v48 = vld [vmem:[%s2745_s25 + $0x38] sm:$0xff] }
 0x2da   :  { %1630 = vmatprep.subr.mxu1 %v2020_v2 }
 0x2db   :  { %1631 = vmatpush3.msra.mxu1 %v805_v49  ;;  %v1235_v49 = vld [vmem:[%s2745_s25 + $0x30] sm:$0xff] }
 0x2dc   :  { %1632 = vmatprep.subr.mxu1 %v2020_v2 }
 0x2dd   :  { %1633 = vmatpush3.msra.mxu1 %v804_v6  ;;  %v1354_v6 = vld [vmem:[%s2744_s24] ss:$0 sm:$0xff] }
 0x2de   :  { %1634 = vmatprep.subr.mxu1 %v2020_v2 }
 0x2df   :  { %1635 = vmatpush3.msra.mxu1 %v803_v7 }
 0x2e0   :  { %1658 = vmatprep.subr.mxu1 %v2020_v2 }
 0x365   :  { %v547_v50 = vpop.f32.mrf.mxu1 }
 0x367   :  { %v1544_v51 = vpop.f32.mrf.mxu1 }
 0x368   :  { %v1233_v51 = vld [vmem:[%s2745_s25 + $0x20] sm:$0xff] }
 0x380   :  { %v620_v53 = vpop.f32.mrf.mxu1 }
 0x381   :  { %v621_v54 = vadd.f32 %v620_v53, %v547_v50  ;;  %v1234_v50 = vld [vmem:[%s2745_s25 + $0x28] sm:$0xff]  ;;  %v1232_v53 = vld [vmem:[%s2745_s25 + $0x18] sm:$0xff] }
 0x382   :  { %v1563_v56 = vpop.f32.mrf.mxu1 }
 0x383   :  { %v699_v57 = vadd.f32 %v695_v30, %v621_v54  ;;  %v1142_v30 = vld [vmem:[%s2743_s23 + $0x38] sm:$0xff]  ;;  %v1349_v54 = vld [vmem:[#allocation2] ss:$0 sm:$0xff] }
 0x385   :  { %v707_v58 = vadd.f32 %v1347_v55, %v699_v57 }
 0x387   :  { %v708_v59 = vmax.f32 %v707_v58, 0.0 }
 0x389   :  { %1602 = vmatmul.mubr.f32.vlgmr.msra.gmra.mxu0 %v708_v59 }
 0x38a   :  { %1640 = vmatpush3.msra.mxu0 %v913_v60  ;;  %1655 = vmatprep.mubr.msk.f32.mxu0 %vm2021_vm0, %v2020_v2  ;;  %v1353_v60 = vld [vmem:[%s2742_s22] ss:$0 sm:$0xff] }
 0x38b   :  { %1641 = vmatprep.subr.mxu0 %v2020_v2 }
 0x38c   :  { %1642 = vmatpush3.msra.mxu0 %v912_v61 }
 0x38d   :  { %1643 = vmatprep.subr.mxu0 %v2020_v2 }
 0x38e   :  { %1644 = vmatpush3.msra.mxu0 %v911_v62 }
 0x38f   :  { %1645 = vmatprep.subr.mxu0 %v2020_v2 }
 0x390   :  { %1646 = vmatpush3.msra.mxu0 %v910_v63 }
 0x391   :  { %1647 = vmatprep.subr.mxu0 %v2020_v2 }
 0x392   :  { %1648 = vmatpush3.msra.mxu0 %v909_v0 }
 0x393   :  { %1649 = vmatprep.subr.mxu0 %v2020_v2 }
 0x394   :  { %1650 = vmatpush3.msra.mxu0 %v908_v1  ;;  %v1231_v1 = vld [vmem:[%s2745_s25 + $0x10] sm:$0xff] }
 0x395   :  { %1651 = vmatprep.subr.mxu0 %v2020_v2 }
 0x396   :  { %1652 = vmatpush3.msra.mxu0 %v907_v4  ;;  %v1230_v4 = vld [vmem:[%s2745_s25 + $0x8] sm:$0xff] }
 0x397   :  { %1653 = vmatprep.subr.mxu0 %v2020_v2 }
 0x398   :  { %1654 = vmatpush3.msra.mxu0 %v906_v5  ;;  %v1229_v5 = vld [vmem:[%s2745_s25] sm:$0xff] }
 0x399   :  { %1656 = vmatmul.mubr.msk.f32.vlgmr.msra.gmra.mxu0 %vm315_vm2, %v2341_v3  ;;  %1677 = vmatprep.subr.mxu0 %v2020_v2  ;;  %v1054_v3 = vld [vmem:[%s2741_s21] sm:$0xff] }
 0x39a   :  { %1679 = vmatprep.mubr.msk.f32.mxu0 %vm2021_vm0, %v2020_v2  ;;  %1678 = vmatpush3.msra.mxu0 %v1054_v3 }
 0x39b   :  { %1717 = vmatprep.subr.mxu0 %v2020_v2 }
 0x39d   :  { %1680 = vmatmul.mubr.msk.f32.vlgmr.msra.gmra.mxu0 %vm625_vm3, %v2332_v52  ;;  %v903_v52 = vld [vmem:[%s2739_s19 + $0x28] sm:$0xff] }
 0x39e   :  { %1749 = vmatprep.mubr.msk.f32.mxu0 %vm2021_vm0, %v2020_v2  ;;  %1718 = vmatpush3.msra.mxu0 %v1244_v40 }
 0x39f   :  { %1719 = vmatprep.subr.mxu0 %v2020_v2 }
 0x3a0   :  { %1720 = vmatpush3.msra.mxu0 %v1243_v41 }
 0x3a1   :  { %1721 = vmatprep.subr.mxu0 %v2020_v2 }
 0x3a2   :  { %1722 = vmatpush3.msra.mxu0 %v1242_v42 }
 0x3a3   :  { %1723 = vmatprep.subr.mxu0 %v2020_v2 }
 0x3a4   :  { %1724 = vmatpush3.msra.mxu0 %v1241_v43 }
 0x3a5   :  { %1725 = vmatprep.subr.mxu0 %v2020_v2 }
 0x3a6   :  { %1726 = vmatpush3.msra.mxu0 %v1240_v44 }
 0x3a7   :  { %1727 = vmatprep.subr.mxu0 %v2020_v2 }
 0x3a8   :  { %1728 = vmatpush3.msra.mxu0 %v1239_v45 }
 0x3a9   :  { %1729 = vmatprep.subr.mxu0 %v2020_v2 }
 0x3aa   :  { %1730 = vmatpush3.msra.mxu0 %v1238_v46 }
 0x3ab   :  { %1731 = vmatprep.subr.mxu0 %v2020_v2 }
 0x3ac   :  { %1732 = vmatpush3.msra.mxu0 %v1237_v47 }
 0x3ad   :  { %1733 = vmatprep.subr.mxu0 %v2020_v2 }
 0x3ae   :  { %1734 = vmatpush3.msra.mxu0 %v1236_v48 }
 0x3af   :  { %1735 = vmatprep.subr.mxu0 %v2020_v2 }
 0x3b0   :  { %1736 = vmatpush3.msra.mxu0 %v1235_v49 }
 0x3b1   :  { %1737 = vmatprep.subr.mxu0 %v2020_v2 }
 0x3b2   :  { %1738 = vmatpush3.msra.mxu0 %v1234_v50 }
 0x3b3   :  { %1739 = vmatprep.subr.mxu0 %v2020_v2 }
 0x3b4   :  { %1740 = vmatpush3.msra.mxu0 %v1233_v51 }
 0x3b5   :  { %1741 = vmatprep.subr.mxu0 %v2020_v2 }
 0x3b6   :  { %1742 = vmatpush3.msra.mxu0 %v1232_v53 }
 0x3b7   :  { %1743 = vmatprep.subr.mxu0 %v2020_v2 }
 0x3b8   :  { %1744 = vmatpush3.msra.mxu0 %v1231_v1 }
 0x3b9   :  { %1745 = vmatprep.subr.mxu0 %v2020_v2 }
 0x3ba   :  { %1746 = vmatpush3.msra.mxu0 %v1230_v4 }
 0x3bb   :  { %1747 = vmatprep.subr.mxu0 %v2020_v2 }
 0x3bc   :  { %1748 = vmatpush3.msra.mxu0 %v1229_v5 }
 0x449   :  { %v798_v9 = vpop.f32.mrf.mxu0 }
 0x44a   :  { %v799_v10 = vadd.f32 %v1348_v8, %v798_v9 }
 0x44b   :  { %v1603_v11 = vpop.f32.mrf.mxu0 }
 0x44c   :  { %v802_v12 = vmax.f32 %v799_v10, 0.0  ;;  %v1355_v10 = vld [vmem:[#allocation3] ss:$0 sm:$0xff] }
 0x44e   :  { %1637 = vmatmul.mubr.f32.vlgmr.msra.gmra.mxu1 %v802_v12 }
 0x44f   :  { %1659 = vmatpush3.msra.mxu1 %v905_v13  ;;  %1674 = vmatprep.mubr.msk.f32.mxu1 %vm2021_vm0, %v2020_v2 }
 0x450   :  { %1660 = vmatprep.subr.mxu1 %v2020_v2 }
 0x451   :  { %1661 = vmatpush3.msra.mxu1 %v904_v14 }
 0x452   :  { %1662 = vmatprep.subr.mxu1 %v2020_v2 }
 0x453   :  { %1663 = vmatpush3.msra.mxu1 %v903_v52 }
 0x454   :  { %1664 = vmatprep.subr.mxu1 %v2020_v2 }
 0x455   :  { %1665 = vmatpush3.msra.mxu1 %v902_v15 }
 0x456   :  { %1666 = vmatprep.subr.mxu1 %v2020_v2 }
 0x457   :  { %1667 = vmatpush3.msra.mxu1 %v901_v16 }
 0x458   :  { %1668 = vmatprep.subr.mxu1 %v2020_v2 }
 0x459   :  { %v2564_v20 = vpop.f32.mrf.mxu0  ;;  %1669 = vmatpush3.msra.mxu1 %v900_v18 }
 0x45a   :  { %1670 = vmatprep.subr.mxu1 %v2020_v2 }
 0x45b   :  { %v1657_v22 = vpop.f32.mrf.mxu0  ;;  %1671 = vmatpush3.msra.mxu1 %v899_v19 }
 0x45c   :  { %1672 = vmatprep.subr.mxu1 %v2020_v2 }
 0x45d   :  { %1673 = vmatpush3.msra.mxu1 %v898_v21  ;;  %v2623_v34 = vpop.f32.mrf.mxu0 }
 0x45e   :  { %1675 = vmatmul.mubr.msk.f32.vlgmr.msra.gmra.mxu1 %vm315_vm2, %v2377_v17  ;;  %1682 = vmatprep.subr.mxu1 %v2020_v2  ;;  %v1147_v17 = vld [vmem:[%s2743_s23 + $0x60] sm:$0xff] }
 0x45f   :  { %1683 = vmatpush3.msra.mxu1 %v1150_v23  ;;  %1714 = vmatprep.mubr.msk.f32.mxu1 %vm2021_vm0, %v2020_v2  ;;  %v1681_v36 = vpop.f32.mrf.mxu0 }
 0x460   :  { %1684 = vmatprep.subr.mxu1 %v2020_v2 }
 0x461   :  { %1685 = vmatpush3.msra.mxu1 %v1149_v24 }
 0x462   :  { %1686 = vmatprep.subr.mxu1 %v2020_v2 }
 0x463   :  { %1687 = vmatpush3.msra.mxu1 %v1148_v25 }
 0x464   :  { %1688 = vmatprep.subr.mxu1 %v2020_v2 }
 0x465   :  { %1689 = vmatpush3.msra.mxu1 %v1147_v17 }
 0x466   :  { %1690 = vmatprep.subr.mxu1 %v2020_v2 }
 0x467   :  { %1691 = vmatpush3.msra.mxu1 %v1146_v26 }
 0x468   :  { %1692 = vmatprep.subr.mxu1 %v2020_v2 }
 0x469   :  { %1693 = vmatpush3.msra.mxu1 %v1145_v27 }
 0x46a   :  { %1694 = vmatprep.subr.mxu1 %v2020_v2 }
 0x46b   :  { %1695 = vmatpush3.msra.mxu1 %v1144_v28 }
 0x46c   :  { %1696 = vmatprep.subr.mxu1 %v2020_v2 }
 0x46d   :  { %1697 = vmatpush3.msra.mxu1 %v1143_v29 }
 0x46e   :  { %1698 = vmatprep.subr.mxu1 %v2020_v2 }
 0x46f   :  { %1699 = vmatpush3.msra.mxu1 %v1142_v30 }
 0x470   :  { %1700 = vmatprep.subr.mxu1 %v2020_v2 }
 0x471   :  { %1701 = vmatpush3.msra.mxu1 %v1141_v31 }
 0x472   :  { %1702 = vmatprep.subr.mxu1 %v2020_v2 }
 0x473   :  { %1703 = vmatpush3.msra.mxu1 %v1140_v32 }
 0x474   :  { %1704 = vmatprep.subr.mxu1 %v2020_v2 }
 0x475   :  { %1705 = vmatpush3.msra.mxu1 %v1139_v33 }
 0x476   :  { %1706 = vmatprep.subr.mxu1 %v2020_v2 }
 0x477   :  { %1707 = vmatpush3.msra.mxu1 %v1138_v35 }
 0x478   :  { %1708 = vmatprep.subr.mxu1 %v2020_v2 }
 0x479   :  { %1709 = vmatpush3.msra.mxu1 %v1137_v37 }
 0x47a   :  { %1710 = vmatprep.subr.mxu1 %v2020_v2 }
 0x47b   :  { %1711 = vmatpush3.msra.mxu1 %v1136_v38 }
 0x47c   :  { %1712 = vmatprep.subr.mxu1 %v2020_v2 }
 0x47d   :  { %1713 = vmatpush3.msra.mxu1 %v1135_v39 }
 0x50e   :  { %v892_v55 = vpop.f32.mrf.mxu1 }
 0x50f   :  { %v893_v56 = vadd.f32 %v1349_v54, %v892_v55 }
 0x510   :  { %v1638_v57 = vpop.f32.mrf.mxu1 }
 0x511   :  { %897 = vst.msk [vmem:[%s2746_s27] sm:$0xff] %vm896_vm4, %v893_v56 }
 0x51e   :  { %v1050_v58 = vpop.f32.mrf.mxu1 }
 0x51f   :  { %v1051_v59 = vadd.f32 %v1050_v58, %v2564_v20 }
 0x520   :  { %v1676_v61 = vpop.f32.mrf.mxu1 }
 0x521   :  { %v1125_v62 = vadd.f32 %v2623_v34, %v1051_v59 }
 0x523   :  { %v1133_v63 = vadd.f32 %v1353_v60, %v1125_v62 }
 0x525   :  { %v1134_v0 = vmax.f32 %v1133_v63, 0.0 }
 0x527   :  { %1715 = vmatmul.mubr.f32.vlgmr.msra.gmra.mxu1 %v1134_v0 }
 0x5e7   :  { %v1224_v7 = vpop.f32.mrf.mxu1 }
 0x5e8   :  { %v1225_v3 = vadd.f32 %v1354_v6, %v1224_v7 }
 0x5e9   :  { %v1716_v8 = vpop.f32.mrf.mxu1 }
 0x5ea   :  { %v1228_v9 = vmax.f32 %v1225_v3, 0.0 }
 0x5ec   :  { %1750 = vmatmul.mubr.f32.vlgmr.msra.gmra.mxu0 %v1228_v9 }
 0x6ac   :  { %v1318_v11 = vpop.f32.mrf.mxu0 }
 0x6ad   :  { %v1319_v12 = vadd.f32 %v1355_v10, %v1318_v11 }
 0x6ae   :  { %v1751_v13 = vpop.f32.mrf.mxu0 }
 0x6af   :  { %1322 = vst.msk [vmem:[%s2747_s28] sm:$0xff] %vm896_vm4, %v1319_v12 }
 0x6b0   :  { %1331 = vsyncpa [#allocation5], 1 }
 0x6b1   :  { %1332 = vsyncpa [#allocation7], 1 }
 0x6b2   :  { %1333 = vsyncpa [#allocation10], 1 }
 0x6b3   :  { %1334 = vsyncpa [#allocation13], 1 }
 0x6b4   :  { %1335 = vsyncpa [#allocation16], 1 }
 0x6b5   :  { %1336 = vsyncpa [#allocation19], 1 }

</bundles_post_ra>
